<compile_context>
chip_gen: v7x
topology: tpu7x:2x2x1
jax: 0.10.0
libtpu: 0.0.40
codegen_flags: <defaults>
</compile_context>

<pallas_src>
import functools

import jax
import jax.numpy as jnp
from jax.experimental import pallas as pl
from jax.experimental.pallas import tpu as pltpu


_LM_HEAD_TILE_V = 256      # lane-dense vocab tile; vocab padded to a multiple of this


def _round_up(x, m):
    return (x + m - 1) // m * m


@functools.lru_cache(maxsize=1)
def _vmem_limit_bytes():
    # ~75% of physical VMEM: ~96 MiB on v5e/v6e (128 MiB), ~48 MiB on v7x (64 MiB).
    try:
        cap = pltpu.get_tpu_info().vmem_capacity_bytes
    except Exception:
        cap = 64 * 1024 * 1024
    return int(cap * 3 // 4)


# ----------------------------- in-kernel math ------------------------------

def _layernorm(x, g, b, eps=1e-5):
    # x: (M, D), g/b: (1, D).  Matches nn.LayerNorm (biased variance, eps=1e-5).
    mu = jnp.mean(x, axis=-1, keepdims=True)
    var = jnp.mean((x - mu) ** 2, axis=-1, keepdims=True)
    return (x - mu) * jax.lax.rsqrt(var + eps) * g + b


def _erf(x):
    # Abramowitz & Stegun 7.1.26 rational approximation (|err| ~1.5e-7).
    a1, a2, a3, a4, a5 = 0.254829592, -0.284496736, 1.421413741, -1.453152027, 1.061405429
    p = 0.3275911
    s = jnp.where(x >= 0.0, 1.0, -1.0).astype(x.dtype)
    ax = jnp.abs(x)
    t = 1.0 / (1.0 + p * ax)
    poly = ((((a5 * t + a4) * t + a3) * t + a2) * t + a1) * t
    return s * (1.0 - poly * jnp.exp(-ax * ax))


def _gelu_exact(x):
    # nn.GELU() default = exact erf-based GELU.
    return 0.5 * x * (1.0 + _erf(x * 0.7071067811865476))


# ----------------------------- Pallas kernels ------------------------------

def blocks_kernel(x_ref,
                  ln1g_ref, ln1b_ref,
                  wqkv_ref, bqkv_ref, wo_ref, bo_ref,
                  ln2g_ref, ln2b_ref,
                  wup_ref, bup_ref, wdn_ref, bdn_ref,
                  lnfg_ref, lnfb_ref,
                  o_ref, res_ref,
                  *, seq, head_num, head_dim, block_batch):
    """Grid = (M blocks, layers).  The residual stream for the current M block
    lives in the f32 VMEM scratch `res_ref` across the layer axis; the kernel
    output is the final-LayerNormed bf16 activation, written at the last layer."""
    layer = pl.program_id(1)
    H, hd, bm = head_num, head_dim, block_batch
    Dh = H * hd

    @pl.when(layer == 0)
    def _():
        res_ref[...] = x_ref[...]

    x = res_ref[...]                                   # (tm, D) f32, VMEM resident

    # --- LayerNorm 1 + fused QKV projection (K = D, full MXU depth) ---
    h = _layernorm(x, ln1g_ref[0], ln1b_ref[0])
    qkv = jnp.dot(h.astype(jnp.bfloat16), wqkv_ref[0],
                  preferred_element_type=jnp.float32) + bqkv_ref[0]   # (tm, 3*Dh) f32

    # causal mask generated in-kernel (no (S, S) HBM tensor / VMEM residency)
    row = jax.lax.broadcasted_iota(jnp.int32, (seq, seq), 0)
    col = jax.lax.broadcasted_iota(jnp.int32, (seq, seq), 1)
    causal = row >= col                                # (S, S) bool
    inv_scale = 1.0 / (float(hd) ** 0.5)

    # --- attention, batched over heads (one sequence per iteration, bm small) ---
    ctx_list = []
    for b in range(bm):
        qkv_b = qkv[b * seq:(b + 1) * seq, :]          # (S, 3*Dh)
        qkv_t = qkv_b.T                                # (3*Dh, S)  single 2-D transpose
        q3 = jnp.swapaxes(qkv_t[0:Dh].reshape(H, hd, seq), -1, -2)     # (H, S, hd)
        k3 = qkv_t[Dh:2 * Dh].reshape(H, hd, seq)                      # (H, hd, S)
        v3 = qkv_t[2 * Dh:3 * Dh].reshape(H, hd, seq)                  # (H, hd, S)
        q3 = (q3 * inv_scale).astype(jnp.bfloat16)     # fold 1/sqrt(hd) into q
        s = jnp.einsum('hqd,hdk->hqk', q3, k3.astype(jnp.bfloat16),
                       preferred_element_type=jnp.float32)             # (H, S, S)
        # torch: masked_fill(-1e10) then scale; masked entries exp to 0 either way
        s = jnp.where(causal[None, :, :], s, -1e10)
        s = s - jnp.max(s, axis=-1, keepdims=True)
        p = jnp.exp(s)
        p = p * (1.0 / jnp.sum(p, axis=-1, keepdims=True))
        # P.V computed directly in (H, hd, S) layout (avoids a transpose)
        ctx_t = jnp.einsum('hdk,hqk->hdq', v3.astype(jnp.bfloat16),
                           p.astype(jnp.bfloat16),
                           preferred_element_type=jnp.float32)         # (H, hd, S)
        ctx_list.append(ctx_t.reshape(Dh, seq).T)                      # (S, Dh)
    ctx = ctx_list[0] if bm == 1 else jnp.concatenate(ctx_list, axis=0)  # (tm, Dh)

    # single fused output projection: contraction K = Dh (full MXU depth)
    proj = jnp.dot(ctx.astype(jnp.bfloat16), wo_ref[0],
                   preferred_element_type=jnp.float32) + bo_ref[0]
    x = x + proj                                        # residual (dropout = identity)

    # --- LayerNorm 2 + GELU MLP ---
    h2 = _layernorm(x, ln2g_ref[0], ln2b_ref[0]).astype(jnp.bfloat16)
    up = jnp.dot(h2, wup_ref[0], preferred_element_type=jnp.float32) + bup_ref[0]
    up = _gelu_exact(up).astype(jnp.bfloat16)
    down = jnp.dot(up, wdn_ref[0], preferred_element_type=jnp.float32) + bdn_ref[0]
    x = x + down                                        # residual (dropout = identity)
    res_ref[...] = x

    # final LayerNorm hoisted here (computed once per M block, not per vocab tile)
    @pl.when(layer == pl.num_programs(1) - 1)
    def _():
        o_ref[...] = _layernorm(x, lnfg_ref[...], lnfb_ref[...]).astype(jnp.bfloat16)


def head_kernel(xn_ref, wlm_ref, blm_ref, o_ref):
    # Tied lm_head: pure matmul + bias (final LayerNorm already applied upstream).
    o_ref[...] = jnp.dot(xn_ref[...], wlm_ref[...],
                         preferred_element_type=jnp.float32) + blm_ref[...]


# ------------------------------- wrappers ----------------------------------

def run_blocks(x2d, bp, lnf_g, lnf_b, *, batch, seq, head_num, head_dim,
               block_batch=1):
    M, D = x2d.shape
    L = bp["w_qkv"].shape[0]
    Dh = head_num * head_dim
    F4 = bp["w_up"].shape[-1]
    bm = block_batch
    assert batch % bm == 0
    num_m = batch // bm
    tm = bm * seq

    def _full(shape):
        return pl.BlockSpec(tuple(shape), lambda m, l: (0,) * len(shape))

    def _per_layer(shape2d):
        return pl.BlockSpec((1,) + tuple(shape2d), lambda m, l: (l, 0, 0))

    in_specs = [
        pl.BlockSpec((tm, D), lambda m, l: (m, 0)),                 # residual input
        _per_layer((1, D)), _per_layer((1, D)),                     # ln1 g,b
        _per_layer((D, 3 * Dh)), _per_layer((1, 3 * Dh)),           # fused qkv
        _per_layer((Dh, D)), _per_layer((1, D)),                    # out proj
        _per_layer((1, D)), _per_layer((1, D)),                     # ln2 g,b
        _per_layer((D, F4)), _per_layer((1, F4)),                   # mlp up
        _per_layer((F4, D)), _per_layer((1, D)),                    # mlp down
        _full((1, D)), _full((1, D)),                               # final ln g,b
    ]
    kernel = functools.partial(blocks_kernel, seq=seq, head_num=head_num,
                               head_dim=head_dim, block_batch=bm)
    return pl.pallas_call(
        kernel,
        out_shape=jax.ShapeDtypeStruct((M, D), jnp.bfloat16),
        grid=(num_m, L),
        in_specs=in_specs,
        out_specs=pl.BlockSpec((tm, D), lambda m, l: (m, 0)),
        scratch_shapes=[pltpu.VMEM((tm, D), jnp.float32)],          # residual stream
        compiler_params=pltpu.CompilerParams(
            dimension_semantics=("parallel", "arbitrary"),
            vmem_limit_bytes=_vmem_limit_bytes()),
    )(x2d,
      bp["ln1_g"], bp["ln1_b"], bp["w_qkv"], bp["b_qkv"], bp["w_o"], bp["b_o"],
      bp["ln2_g"], bp["ln2_b"], bp["w_up"], bp["b_up"], bp["w_dn"], bp["b_dn"],
      lnf_g, lnf_b)


def run_head(xn, wlm_t, blm, *, batch, seq):
    M, D = xn.shape
    Vp = wlm_t.shape[1]
    tv = min(_LM_HEAD_TILE_V, Vp)
    assert Vp % tv == 0, "vocab must be padded to a multiple of the vocab tile"
    # token tile ~512 rows, aligned to whole sequences
    bm = max(1, min(batch, 512 // seq if seq <= 512 else 1))
    while batch % bm:
        bm -= 1
    tmh = bm * seq
    return pl.pallas_call(
        head_kernel,
        out_shape=jax.ShapeDtypeStruct((M, Vp), jnp.float32),
        grid=(M // tmh, Vp // tv),
        in_specs=[pl.BlockSpec((tmh, D), lambda m, v: (m, 0)),
                  pl.BlockSpec((D, tv), lambda m, v: (0, v)),
                  pl.BlockSpec((1, tv), lambda m, v: (0, v))],
        out_specs=pl.BlockSpec((tmh, tv), lambda m, v: (m, v)),
        compiler_params=pltpu.CompilerParams(
            dimension_semantics=("parallel", "parallel"),
            vmem_limit_bytes=_vmem_limit_bytes()),
    )(xn, wlm_t, blm)


def gpt_forward(idx, params, cfg):
    """GPT.forward(idx, target=None) -> logits  (loss path not used)."""
    B, S = idx.shape
    D = cfg["hidden_dim"]
    V = cfg["vocab_size"]
    assert S <= cfg["max_seq_len"]
    # Embedding gather + positional add (plain JAX glue), flatten to (B*S, D).
    tok = params["tok_emb"][idx]                                  # (B, S, D)
    pos = params["pos_emb"][:S]                                   # (S, D)
    x = (tok + pos[None, :, :]).reshape(B * S, D).astype(jnp.float32)
    xn = run_blocks(x, params["blocks"], params["lnf_g"], params["lnf_b"],
                    batch=B, seq=S, head_num=cfg["head_num"],
                    head_dim=cfg["head_dim"],
                    block_batch=cfg.get("block_batch", 1))        # (B*S, D) bf16, LN'd
    logits = run_head(xn, params["lm_w_t"], params["lm_bias"], batch=B, seq=S)
    if logits.shape[1] != V:
        logits = logits[:, :V]                                    # drop vocab padding
    return logits.reshape(B, S, V)
    # TODO(synk): cross-entropy loss (target path) and generate() sampling not implemented.


# ----------------------------- param init ----------------------------------

def init_params(key, cfg):
    D = cfg["hidden_dim"]
    V = cfg["vocab_size"]
    L = cfg["num_layers"]
    H = cfg["head_num"]
    hd = cfg["head_dim"]
    Dh = H * hd
    F4 = 4 * D
    bf = jnp.bfloat16
    Vp = _round_up(V, _LM_HEAD_TILE_V)

    def normal(k, shape, dtype=jnp.float32):
        return (0.02 * jax.random.normal(k, shape, jnp.float32)).astype(dtype)

    keys = jax.random.split(key, 8)
    tok = normal(keys[0], (V, D))
    lm_w_t = jnp.zeros((D, Vp), jnp.float32).at[:, :V].set(tok.T).astype(bf)
    params = {
        "tok_emb": tok,                                 # (V, D) f32 for gather
        "pos_emb": normal(keys[1], (cfg["max_seq_len"], D)),
        "lnf_g": jnp.ones((1, D), jnp.float32),
        "lnf_b": jnp.zeros((1, D), jnp.float32),
        "lm_w_t": lm_w_t,                               # tied head, transposed + vocab-padded ONCE, bf16
        "lm_bias": jnp.zeros((1, Vp), jnp.float32),
        "blocks": {
            "ln1_g": jnp.ones((L, 1, D), jnp.float32),
            "ln1_b": jnp.zeros((L, 1, D), jnp.float32),
            "w_qkv": normal(keys[2], (L, D, 3 * Dh), bf),   # fused Q|K|V
            "b_qkv": jnp.zeros((L, 1, 3 * Dh), jnp.float32),
            "w_o":   normal(keys[3], (L, Dh, D), bf),
            "b_o":   jnp.zeros((L, 1, D), jnp.float32),
            "ln2_g": jnp.ones((L, 1, D), jnp.float32),
            "ln2_b": jnp.zeros((L, 1, D), jnp.float32),
            "w_up":  normal(keys[4], (L, D, F4), bf),
            "b_up":  jnp.zeros((L, 1, F4), jnp.float32),
            "w_dn":  normal(keys[5], (L, F4, D), bf),
            "b_dn":  jnp.zeros((L, 1, D), jnp.float32),
        },
    }
    return params


# --------------------------------- main -------------------------------------

if __name__ == "__main__":
    cfg = dict(
        vocab_size=256,
        head_num=4,
        hidden_dim=32,
        num_layers=2,
        max_seq_len=16,
        head_dim=32 // 4,
        block_batch=1,        # sequences per M block (grid M-axis exercised)
    )
    B, S = 2, 8

    key = jax.random.PRNGKey(0)
    k_params, k_idx = jax.random.split(key)
    params = init_params(k_params, cfg)
    idx = jax.random.randint(k_idx, (B, S), 0, cfg["vocab_size"], dtype=jnp.int32)

    forward = jax.jit(lambda i, p: gpt_forward(i, p, cfg))
    logits = jax.block_until_ready(forward(idx, params))
    assert logits.shape == (B, S, cfg["vocab_size"])
    assert bool(jnp.all(jnp.isfinite(logits)))
    print("KERNEL_OK")
</pallas_src>

<mosaic_0001>
module attributes {stable_mosaic.version = 11 : i64} {
  func.func @head_kernel(%arg0: i32, %arg1: i32, %arg2: memref<16x32xbf16, #tpu.memory_space<vmem>>, %arg3: memref<32x256xbf16, #tpu.memory_space<vmem>>, %arg4: memref<1x256xf32, #tpu.memory_space<vmem>>, %arg5: memref<16x256xf32, #tpu.memory_space<vmem>>) attributes {dimension_semantics = [#tpu.dimension_semantics<parallel>, #tpu.dimension_semantics<parallel>], iteration_bounds = array<i64: 1, 1>, scalar_prefetch = 0 : i64, scratch_operands = 0 : i64, tpu.core_type = #tpu.core_type<tc>, window_params = [{transform_indices = @transform_0, window_bounds = array<i64: 16, 32>}, {transform_indices = @transform_1, window_bounds = array<i64: 32, 256>}, {transform_indices = @transform_2, window_bounds = array<i64: 1, 256>}, {transform_indices = @transform_3, window_bounds = array<i64: 16, 256>}]} {
    %c0 = arith.constant 0 : index
    %c0_0 = arith.constant 0 : index
    %0 = vector.load %arg2[%c0, %c0_0] : memref<16x32xbf16, #tpu.memory_space<vmem>>, vector<16x32xbf16>
    %c0_1 = arith.constant 0 : index
    %c0_2 = arith.constant 0 : index
    %1 = vector.load %arg3[%c0_1, %c0_2] : memref<32x256xbf16, #tpu.memory_space<vmem>>, vector<32x256xbf16>
    %cst = arith.constant dense<0.000000e+00> : vector<16x256xf32>
    %2 = tpu.matmul %0, %1, %cst {dimension_numbers = #tpu.dot_dimension_numbers<[1], [0], [0], [1], [0, 0, 1, 1], [], []>} : vector<16x32xbf16>, vector<32x256xbf16>, vector<16x256xf32> -> vector<16x256xf32>
    %c0_3 = arith.constant 0 : index
    %c0_4 = arith.constant 0 : index
    %3 = vector.load %arg4[%c0_3, %c0_4] : memref<1x256xf32, #tpu.memory_space<vmem>>, vector<1x256xf32>
    %4 = vector.broadcast %3 : vector<1x256xf32> to vector<16x256xf32>
    %5 = arith.addf %2, %4 : vector<16x256xf32>
    %c0_5 = arith.constant 0 : index
    %c0_6 = arith.constant 0 : index
    %6 = vector.load %arg5[%c0_5, %c0_6] : memref<16x256xf32, #tpu.memory_space<vmem>>, vector<16x256xf32>
    tpu.vector_store %arg5[%c0_5, %c0_6], %5 {strides = array<i32>} : memref<16x256xf32, #tpu.memory_space<vmem>>, vector<16x256xf32>,
    return
  }
  func.func @transform_0(%arg0: i32, %arg1: i32) -> (i32, i32) {
    %c0_i32 = arith.constant 0 : i32
    %c0_i32_0 = arith.constant 0 : i32
    return %arg0, %c0_i32 : i32, i32
  }
  func.func @transform_1(%arg0: i32, %arg1: i32) -> (i32, i32) {
    %c0_i32 = arith.constant 0 : i32
    %c0_i32_0 = arith.constant 0 : i32
    return %c0_i32, %arg1 : i32, i32
  }
  func.func @transform_2(%arg0: i32, %arg1: i32) -> (i32, i32) {
    %c0_i32 = arith.constant 0 : i32
    %c0_i32_0 = arith.constant 0 : i32
    return %c0_i32, %arg1 : i32, i32
  }
  func.func @transform_3(%arg0: i32, %arg1: i32) -> (i32, i32) {
    %c0_i32 = arith.constant 0 : i32
    return %arg0, %arg1 : i32, i32
  }
}

module attributes {stable_mosaic.version = 11 : i64} {
  func.func @blocks_kernel(%arg0: i32, %arg1: i32, %arg2: memref<8x32xf32, #tpu.memory_space<vmem>>, %arg3: memref<1x1x32xf32, #tpu.memory_space<vmem>>, %arg4: memref<1x1x32xf32, #tpu.memory_space<vmem>>, %arg5: memref<1x32x96xbf16, #tpu.memory_space<vmem>>, %arg6: memref<1x1x96xf32, #tpu.memory_space<vmem>>, %arg7: memref<1x32x32xbf16, #tpu.memory_space<vmem>>, %arg8: memref<1x1x32xf32, #tpu.memory_space<vmem>>, %arg9: memref<1x1x32xf32, #tpu.memory_space<vmem>>, %arg10: memref<1x1x32xf32, #tpu.memory_space<vmem>>, %arg11: memref<1x32x128xbf16, #tpu.memory_space<vmem>>, %arg12: memref<1x1x128xf32, #tpu.memory_space<vmem>>, %arg13: memref<1x128x32xbf16, #tpu.memory_space<vmem>>, %arg14: memref<1x1x32xf32, #tpu.memory_space<vmem>>, %arg15: memref<1x32xf32, #tpu.memory_space<vmem>>, %arg16: memref<1x32xf32, #tpu.memory_space<vmem>>, %arg17: memref<8x32xbf16, #tpu.memory_space<vmem>>, %arg18: memref<8x32xf32, #tpu.memory_space<vmem>>) attributes {dimension_semantics = [#tpu.dimension_semantics<parallel>, #tpu.dimension_semantics<arbitrary>], iteration_bounds = array<i64: 2, 2>, scalar_prefetch = 0 : i64, scratch_operands = 1 : i64, tpu.core_type = #tpu.core_type<tc>, window_params = [{transform_indices = @transform_0, window_bounds = array<i64: 8, 32>}, {transform_indices = @transform_1, window_bounds = array<i64: 1, 1, 32>}, {transform_indices = @transform_2, window_bounds = array<i64: 1, 1, 32>}, {transform_indices = @transform_3, window_bounds = array<i64: 1, 32, 96>}, {transform_indices = @transform_4, window_bounds = array<i64: 1, 1, 96>}, {transform_indices = @transform_5, window_bounds = array<i64: 1, 32, 32>}, {transform_indices = @transform_6, window_bounds = array<i64: 1, 1, 32>}, {transform_indices = @transform_7, window_bounds = array<i64: 1, 1, 32>}, {transform_indices = @transform_8, window_bounds = array<i64: 1, 1, 32>}, {transform_indices = @transform_9, window_bounds = array<i64: 1, 32, 128>}, {transform_indices = @transform_10, window_bounds = array<i64: 1, 1, 128>}, {transform_indices = @transform_11, window_bounds = array<i64: 1, 128, 32>}, {transform_indices = @transform_12, window_bounds = array<i64: 1, 1, 32>}, {pipeline_mode = #tpu.pipeline_mode<synchronous>, transform_indices = @transform_13, window_bounds = array<i64: 1, 32>}, {pipeline_mode = #tpu.pipeline_mode<synchronous>, transform_indices = @transform_14, window_bounds = array<i64: 1, 32>}, {transform_indices = @transform_15, window_bounds = array<i64: 8, 32>}]} {
    %c0_i32 = arith.constant 0 : i32
    %0 = arith.cmpi eq, %arg1, %c0_i32 : i32
    %1 = arith.extui %0 : i1 to i32
    %c0_i32_0 = arith.constant 0 : i32
    %2 = arith.cmpi ne, %1, %c0_i32_0 : i32
    scf.if %2 {
      %c0_77 = arith.constant 0 : index
      %c0_78 = arith.constant 0 : index
      %172 = vector.load %arg2[%c0_77, %c0_78] : memref<8x32xf32, #tpu.memory_space<vmem>>, vector<8x32xf32>
      %c0_79 = arith.constant 0 : index
      %c0_80 = arith.constant 0 : index
      %173 = vector.load %arg18[%c0_79, %c0_80] : memref<8x32xf32, #tpu.memory_space<vmem>>, vector<8x32xf32>
      tpu.vector_store %arg18[%c0_79, %c0_80], %172 {strides = array<i32>} : memref<8x32xf32, #tpu.memory_space<vmem>>, vector<8x32xf32>,
    } else {
    }
    %c0 = arith.constant 0 : index
    %c0_1 = arith.constant 0 : index
    %3 = vector.load %arg18[%c0, %c0_1] : memref<8x32xf32, #tpu.memory_space<vmem>>, vector<8x32xf32>
    %c0_2 = arith.constant 0 : index
    %c0_3 = arith.constant 0 : index
    %c0_4 = arith.constant 0 : index
    %4 = vector.load %arg3[%c0_2, %c0_3, %c0_4] : memref<1x1x32xf32, #tpu.memory_space<vmem>>, vector<1x1x32xf32>
    %5 = vector.shape_cast %4 : vector<1x1x32xf32> to vector<1x32xf32>
    %c0_5 = arith.constant 0 : index
    %c0_6 = arith.constant 0 : index
    %c0_7 = arith.constant 0 : index
    %6 = vector.load %arg4[%c0_5, %c0_6, %c0_7] : memref<1x1x32xf32, #tpu.memory_space<vmem>>, vector<1x1x32xf32>
    %7 = vector.shape_cast %6 : vector<1x1x32xf32> to vector<1x32xf32>
    %cst = arith.constant dense<0.000000e+00> : vector<8xf32>
    %8 = vector.multi_reduction <add>, %3, %cst [1] : vector<8x32xf32> to vector<8xf32>
    %9 = vector.shape_cast %8 : vector<8xf32> to vector<8x1xf32>
    %cst_8 = arith.constant 3.200000e+01 : f32
    %10 = vector.broadcast %cst_8 : f32 to vector<8x1xf32>
    %11 = arith.divf %9, %10 : vector<8x1xf32>
    %12 = vector.broadcast %11 : vector<8x1xf32> to vector<8x32xf32>
    %13 = arith.subf %3, %12 : vector<8x32xf32>
    %14 = arith.mulf %13, %13 : vector<8x32xf32>
    %cst_9 = arith.constant dense<0.000000e+00> : vector<8xf32>
    %15 = vector.multi_reduction <add>, %14, %cst_9 [1] : vector<8x32xf32> to vector<8xf32>
    %16 = vector.shape_cast %15 : vector<8xf32> to vector<8x1xf32>
    %cst_10 = arith.constant 3.200000e+01 : f32
    %17 = vector.broadcast %cst_10 : f32 to vector<8x1xf32>
    %18 = arith.divf %16, %17 : vector<8x1xf32>
    %19 = vector.broadcast %11 : vector<8x1xf32> to vector<8x32xf32>
    %20 = arith.subf %3, %19 : vector<8x32xf32>
    %cst_11 = arith.constant 9.99999974E-6 : f32
    %21 = vector.broadcast %cst_11 : f32 to vector<8x1xf32>
    %22 = arith.addf %18, %21 : vector<8x1xf32>
    %23 = math.rsqrt %22 : vector<8x1xf32>
    %24 = vector.broadcast %23 : vector<8x1xf32> to vector<8x32xf32>
    %25 = arith.mulf %20, %24 : vector<8x32xf32>
    %26 = vector.broadcast %5 : vector<1x32xf32> to vector<8x32xf32>
    %27 = arith.mulf %25, %26 : vector<8x32xf32>
    %28 = vector.broadcast %7 : vector<1x32xf32> to vector<8x32xf32>
    %29 = arith.addf %27, %28 : vector<8x32xf32>
    %30 = arith.truncf %29 : vector<8x32xf32> to vector<8x32xbf16>
    %c0_12 = arith.constant 0 : index
    %c0_13 = arith.constant 0 : index
    %c0_14 = arith.constant 0 : index
    %31 = vector.load %arg5[%c0_12, %c0_13, %c0_14] : memref<1x32x96xbf16, #tpu.memory_space<vmem>>, vector<1x32x96xbf16>
    %32 = vector.shape_cast %31 : vector<1x32x96xbf16> to vector<32x96xbf16>
    %cst_15 = arith.constant dense<0.000000e+00> : vector<8x96xf32>
    %33 = tpu.matmul %30, %32, %cst_15 {dimension_numbers = #tpu.dot_dimension_numbers<[1], [0], [0], [1], [0, 0, 1, 1], [], []>} : vector<8x32xbf16>, vector<32x96xbf16>, vector<8x96xf32> -> vector<8x96xf32>
    %c0_16 = arith.constant 0 : index
    %c0_17 = arith.constant 0 : index
    %c0_18 = arith.constant 0 : index
    %34 = vector.load %arg6[%c0_16, %c0_17, %c0_18] : memref<1x1x96xf32, #tpu.memory_space<vmem>>, vector<1x1x96xf32>
    %35 = vector.shape_cast %34 : vector<1x1x96xf32> to vector<1x96xf32>
    %36 = vector.broadcast %35 : vector<1x96xf32> to vector<8x96xf32>
    %37 = arith.addf %33, %36 : vector<8x96xf32>
    %38 = tpu.iota {dimensions = array<i32: 0>} : vector<8x8xi32>
    %39 = tpu.iota {dimensions = array<i32: 1>} : vector<8x8xi32>
    %40 = arith.cmpi sge, %38, %39 : vector<8x8xi32>
    %41 = tpu.transpose %37, [1, 0] : vector<8x96xf32> -> vector<96x8xf32>
    %42 = vector.extract_strided_slice %41 {offsets = [0, 0], sizes = [32, 8], strides = [1, 1]} : vector<96x8xf32> to vector<32x8xf32>
    %43 = vector.shape_cast %42 : vector<32x8xf32> to vector<4x8x8xf32>
    %44 = tpu.transpose %43, [0, 2, 1] : vector<4x8x8xf32> -> vector<4x8x8xf32>
    %45 = vector.extract_strided_slice %41 {offsets = [32, 0], sizes = [32, 8], strides = [1, 1]} : vector<96x8xf32> to vector<32x8xf32>
    %46 = vector.shape_cast %45 : vector<32x8xf32> to vector<4x8x8xf32>
    %47 = vector.extract_strided_slice %41 {offsets = [64, 0], sizes = [32, 8], strides = [1, 1]} : vector<96x8xf32> to vector<32x8xf32>
    %48 = vector.shape_cast %47 : vector<32x8xf32> to vector<4x8x8xf32>
    %cst_19 = arith.constant 0.353553385 : f32
    %49 = vector.broadcast %cst_19 : f32 to vector<4x8x8xf32>
    %50 = arith.mulf %44, %49 : vector<4x8x8xf32>
    %51 = arith.truncf %50 : vector<4x8x8xf32> to vector<4x8x8xbf16>
    %52 = arith.truncf %46 : vector<4x8x8xf32> to vector<4x8x8xbf16>
    "tpu.trace_start"() <{level = 10 : i32, message = "hqd,hdk->hqk"}> : () -> ()
    %cst_20 = arith.constant dense<0.000000e+00> : vector<4x8x8xf32>
    %53 = tpu.matmul %51, %52, %cst_20 {dimension_numbers = #tpu.dot_dimension_numbers<[2], [1], [1], [2], [0, 0, 0, 1, 1, 2], [0], [0]>} : vector<4x8x8xbf16>, vector<4x8x8xbf16>, vector<4x8x8xf32> -> vector<4x8x8xf32>
    "tpu.trace_stop"() : () -> ()
    %54 = vector.shape_cast %40 : vector<8x8xi1> to vector<1x8x8xi1>
    %cst_21 = arith.constant -1.000000e+10 : f32
    %55 = vector.shape_cast %54 : vector<1x8x8xi1> to vector<1x8x8xi1>
    %56 = vector.broadcast %55 : vector<1x8x8xi1> to vector<4x8x8xi1>
    %57 = vector.broadcast %cst_21 : f32 to vector<4x8x8xf32>
    %58 = arith.select %56, %53, %57 : vector<4x8x8xi1>, vector<4x8x8xf32>
    %cst_22 = arith.constant dense<0xFF800000> : vector<4x8xf32>
    %59 = vector.multi_reduction <maximumf>, %58, %cst_22 [2] : vector<4x8x8xf32> to vector<4x8xf32>
    %60 = vector.shape_cast %59 : vector<4x8xf32> to vector<4x8x1xf32>
    %61 = vector.broadcast %60 : vector<4x8x1xf32> to vector<4x8x8xf32>
    %62 = arith.subf %58, %61 : vector<4x8x8xf32>
    %63 = math.exp %62 : vector<4x8x8xf32>
    %cst_23 = arith.constant dense<0.000000e+00> : vector<4x8xf32>
    %64 = vector.multi_reduction <add>, %63, %cst_23 [2] : vector<4x8x8xf32> to vector<4x8xf32>
    %65 = vector.shape_cast %64 : vector<4x8xf32> to vector<4x8x1xf32>
    %cst_24 = arith.constant 1.000000e+00 : f32
    %66 = vector.broadcast %cst_24 : f32 to vector<4x8x1xf32>
    %67 = arith.divf %66, %65 : vector<4x8x1xf32>
    %68 = vector.broadcast %67 : vector<4x8x1xf32> to vector<4x8x8xf32>
    %69 = arith.mulf %63, %68 : vector<4x8x8xf32>
    %70 = arith.truncf %48 : vector<4x8x8xf32> to vector<4x8x8xbf16>
    %71 = arith.truncf %69 : vector<4x8x8xf32> to vector<4x8x8xbf16>
    "tpu.trace_start"() <{level = 10 : i32, message = "hdk,hqk->hdq"}> : () -> ()
    %cst_25 = arith.constant dense<0.000000e+00> : vector<4x8x8xf32>
    %72 = tpu.matmul %70, %71, %cst_25 {dimension_numbers = #tpu.dot_dimension_numbers<[2], [2], [1], [1], [0, 0, 0, 1, 1, 1], [0], [0]>} : vector<4x8x8xbf16>, vector<4x8x8xbf16>, vector<4x8x8xf32> -> vector<4x8x8xf32>
    "tpu.trace_stop"() : () -> ()
    %73 = vector.shape_cast %72 : vector<4x8x8xf32> to vector<32x8xf32>
    %74 = tpu.transpose %73, [1, 0] : vector<32x8xf32> -> vector<8x32xf32>
    %75 = arith.truncf %74 : vector<8x32xf32> to vector<8x32xbf16>
    %c0_26 = arith.constant 0 : index
    %c0_27 = arith.constant 0 : index
    %c0_28 = arith.constant 0 : index
    %76 = vector.load %arg7[%c0_26, %c0_27, %c0_28] : memref<1x32x32xbf16, #tpu.memory_space<vmem>>, vector<1x32x32xbf16>
    %77 = vector.shape_cast %76 : vector<1x32x32xbf16> to vector<32x32xbf16>
    %cst_29 = arith.constant dense<0.000000e+00> : vector<8x32xf32>
    %78 = tpu.matmul %75, %77, %cst_29 {dimension_numbers = #tpu.dot_dimension_numbers<[1], [0], [0], [1], [0, 0, 1, 1], [], []>} : vector<8x32xbf16>, vector<32x32xbf16>, vector<8x32xf32> -> vector<8x32xf32>
    %c0_30 = arith.constant 0 : index
    %c0_31 = arith.constant 0 : index
    %c0_32 = arith.constant 0 : index
    %79 = vector.load %arg8[%c0_30, %c0_31, %c0_32] : memref<1x1x32xf32, #tpu.memory_space<vmem>>, vector<1x1x32xf32>
    %80 = vector.shape_cast %79 : vector<1x1x32xf32> to vector<1x32xf32>
    %81 = vector.broadcast %80 : vector<1x32xf32> to vector<8x32xf32>
    %82 = arith.addf %78, %81 : vector<8x32xf32>
    %83 = arith.addf %3, %82 : vector<8x32xf32>
    %c0_33 = arith.constant 0 : index
    %c0_34 = arith.constant 0 : index
    %c0_35 = arith.constant 0 : index
    %84 = vector.load %arg9[%c0_33, %c0_34, %c0_35] : memref<1x1x32xf32, #tpu.memory_space<vmem>>, vector<1x1x32xf32>
    %85 = vector.shape_cast %84 : vector<1x1x32xf32> to vector<1x32xf32>
    %c0_36 = arith.constant 0 : index
    %c0_37 = arith.constant 0 : index
    %c0_38 = arith.constant 0 : index
    %86 = vector.load %arg10[%c0_36, %c0_37, %c0_38] : memref<1x1x32xf32, #tpu.memory_space<vmem>>, vector<1x1x32xf32>
    %87 = vector.shape_cast %86 : vector<1x1x32xf32> to vector<1x32xf32>
    %cst_39 = arith.constant dense<0.000000e+00> : vector<8xf32>
    %88 = vector.multi_reduction <add>, %83, %cst_39 [1] : vector<8x32xf32> to vector<8xf32>
    %89 = vector.shape_cast %88 : vector<8xf32> to vector<8x1xf32>
    %cst_40 = arith.constant 3.200000e+01 : f32
    %90 = vector.broadcast %cst_40 : f32 to vector<8x1xf32>
    %91 = arith.divf %89, %90 : vector<8x1xf32>
    %92 = vector.broadcast %91 : vector<8x1xf32> to vector<8x32xf32>
    %93 = arith.subf %83, %92 : vector<8x32xf32>
    %94 = arith.mulf %93, %93 : vector<8x32xf32>
    %cst_41 = arith.constant dense<0.000000e+00> : vector<8xf32>
    %95 = vector.multi_reduction <add>, %94, %cst_41 [1] : vector<8x32xf32> to vector<8xf32>
    %96 = vector.shape_cast %95 : vector<8xf32> to vector<8x1xf32>
    %cst_42 = arith.constant 3.200000e+01 : f32
    %97 = vector.broadcast %cst_42 : f32 to vector<8x1xf32>
    %98 = arith.divf %96, %97 : vector<8x1xf32>
    %99 = vector.broadcast %91 : vector<8x1xf32> to vector<8x32xf32>
    %100 = arith.subf %83, %99 : vector<8x32xf32>
    %cst_43 = arith.constant 9.99999974E-6 : f32
    %101 = vector.broadcast %cst_43 : f32 to vector<8x1xf32>
    %102 = arith.addf %98, %101 : vector<8x1xf32>
    %103 = math.rsqrt %102 : vector<8x1xf32>
    %104 = vector.broadcast %103 : vector<8x1xf32> to vector<8x32xf32>
    %105 = arith.mulf %100, %104 : vector<8x32xf32>
    %106 = vector.broadcast %85 : vector<1x32xf32> to vector<8x32xf32>
    %107 = arith.mulf %105, %106 : vector<8x32xf32>
    %108 = vector.broadcast %87 : vector<1x32xf32> to vector<8x32xf32>
    %109 = arith.addf %107, %108 : vector<8x32xf32>
    %110 = arith.truncf %109 : vector<8x32xf32> to vector<8x32xbf16>
    %c0_44 = arith.constant 0 : index
    %c0_45 = arith.constant 0 : index
    %c0_46 = arith.constant 0 : index
    %111 = vector.load %arg11[%c0_44, %c0_45, %c0_46] : memref<1x32x128xbf16, #tpu.memory_space<vmem>>, vector<1x32x128xbf16>
    %112 = vector.shape_cast %111 : vector<1x32x128xbf16> to vector<32x128xbf16>
    %cst_47 = arith.constant dense<0.000000e+00> : vector<8x128xf32>
    %113 = tpu.matmul %110, %112, %cst_47 {dimension_numbers = #tpu.dot_dimension_numbers<[1], [0], [0], [1], [0, 0, 1, 1], [], []>} : vector<8x32xbf16>, vector<32x128xbf16>, vector<8x128xf32> -> vector<8x128xf32>
    %c0_48 = arith.constant 0 : index
    %c0_49 = arith.constant 0 : index
    %c0_50 = arith.constant 0 : index
    %114 = vector.load %arg12[%c0_48, %c0_49, %c0_50] : memref<1x1x128xf32, #tpu.memory_space<vmem>>, vector<1x1x128xf32>
    %115 = vector.shape_cast %114 : vector<1x1x128xf32> to vector<1x128xf32>
    %116 = vector.broadcast %115 : vector<1x128xf32> to vector<8x128xf32>
    %117 = arith.addf %113, %116 : vector<8x128xf32>
    %cst_51 = arith.constant 5.000000e-01 : f32
    %118 = vector.broadcast %cst_51 : f32 to vector<8x128xf32>
    %119 = arith.mulf %118, %117 : vector<8x128xf32>
    %cst_52 = arith.constant 0.707106769 : f32
    %120 = vector.broadcast %cst_52 : f32 to vector<8x128xf32>
    %121 = arith.mulf %117, %120 : vector<8x128xf32>
    %cst_53 = arith.constant 0.000000e+00 : f32
    %122 = vector.broadcast %cst_53 : f32 to vector<8x128xf32>
    %123 = arith.cmpf oge, %121, %122 : vector<8x128xf32>
    %cst_54 = arith.constant 1.000000e+00 : f32
    %cst_55 = arith.constant -1.000000e+00 : f32
    %124 = vector.broadcast %cst_54 : f32 to vector<8x128xf32>
    %125 = vector.broadcast %cst_55 : f32 to vector<8x128xf32>
    %126 = arith.select %123, %124, %125 : vector<8x128xi1>, vector<8x128xf32>
    %127 = math.absf %121 : vector<8x128xf32>
    %cst_56 = arith.constant 0.327591091 : f32
    %128 = vector.broadcast %cst_56 : f32 to vector<8x128xf32>
    %129 = arith.mulf %128, %127 : vector<8x128xf32>
    %cst_57 = arith.constant 1.000000e+00 : f32
    %130 = vector.broadcast %cst_57 : f32 to vector<8x128xf32>
    %131 = arith.addf %130, %129 : vector<8x128xf32>
    %cst_58 = arith.constant 1.000000e+00 : f32
    %132 = vector.broadcast %cst_58 : f32 to vector<8x128xf32>
    %133 = arith.divf %132, %131 : vector<8x128xf32>
    %cst_59 = arith.constant 1.06140542 : f32
    %134 = vector.broadcast %cst_59 : f32 to vector<8x128xf32>
    %135 = arith.mulf %134, %133 : vector<8x128xf32>
    %cst_60 = arith.constant -1.45315206 : f32
    %136 = vector.broadcast %cst_60 : f32 to vector<8x128xf32>
    %137 = arith.addf %135, %136 : vector<8x128xf32>
    %138 = arith.mulf %137, %133 : vector<8x128xf32>
    %cst_61 = arith.constant 1.42141378 : f32
    %139 = vector.broadcast %cst_61 : f32 to vector<8x128xf32>
    %140 = arith.addf %138, %139 : vector<8x128xf32>
    %141 = arith.mulf %140, %133 : vector<8x128xf32>
    %cst_62 = arith.constant -0.284496725 : f32
    %142 = vector.broadcast %cst_62 : f32 to vector<8x128xf32>
    %143 = arith.addf %141, %142 : vector<8x128xf32>
    %144 = arith.mulf %143, %133 : vector<8x128xf32>
    %cst_63 = arith.constant 0.254829586 : f32
    %145 = vector.broadcast %cst_63 : f32 to vector<8x128xf32>
    %146 = arith.addf %144, %145 : vector<8x128xf32>
    %147 = arith.mulf %146, %133 : vector<8x128xf32>
    %cst_64 = arith.constant 0.000000e+00 : f32
    %148 = vector.broadcast %cst_64 : f32 to vector<8x128xf32>
    %149 = arith.subf %148, %127 : vector<8x128xf32>
    %150 = arith.mulf %149, %127 : vector<8x128xf32>
    %151 = math.exp %150 : vector<8x128xf32>
    %152 = arith.mulf %147, %151 : vector<8x128xf32>
    %cst_65 = arith.constant 1.000000e+00 : f32
    %153 = vector.broadcast %cst_65 : f32 to vector<8x128xf32>
    %154 = arith.subf %153, %152 : vector<8x128xf32>
    %155 = arith.mulf %126, %154 : vector<8x128xf32>
    %cst_66 = arith.constant 1.000000e+00 : f32
    %156 = vector.broadcast %cst_66 : f32 to vector<8x128xf32>
    %157 = arith.addf %156, %155 : vector<8x128xf32>
    %158 = arith.mulf %119, %157 : vector<8x128xf32>
    %159 = arith.truncf %158 : vector<8x128xf32> to vector<8x128xbf16>
    %c0_67 = arith.constant 0 : index
    %c0_68 = arith.constant 0 : index
    %c0_69 = arith.constant 0 : index
    %160 = vector.load %arg13[%c0_67, %c0_68, %c0_69] : memref<1x128x32xbf16, #tpu.memory_space<vmem>>, vector<1x128x32xbf16>
    %161 = vector.shape_cast %160 : vector<1x128x32xbf16> to vector<128x32xbf16>
    %cst_70 = arith.constant dense<0.000000e+00> : vector<8x32xf32>
    %162 = tpu.matmul %159, %161, %cst_70 {dimension_numbers = #tpu.dot_dimension_numbers<[1], [0], [0], [1], [0, 0, 1, 1], [], []>} : vector<8x128xbf16>, vector<128x32xbf16>, vector<8x32xf32> -> vector<8x32xf32>
    %c0_71 = arith.constant 0 : index
    %c0_72 = arith.constant 0 : index
    %c0_73 = arith.constant 0 : index
    %163 = vector.load %arg14[%c0_71, %c0_72, %c0_73] : memref<1x1x32xf32, #tpu.memory_space<vmem>>, vector<1x1x32xf32>
    %164 = vector.shape_cast %163 : vector<1x1x32xf32> to vector<1x32xf32>
    %165 = vector.broadcast %164 : vector<1x32xf32> to vector<8x32xf32>
    %166 = arith.addf %162, %165 : vector<8x32xf32>
    %167 = arith.addf %83, %166 : vector<8x32xf32>
    %c0_74 = arith.constant 0 : index
    %c0_75 = arith.constant 0 : index
    %168 = vector.load %arg18[%c0_74, %c0_75] : memref<8x32xf32, #tpu.memory_space<vmem>>, vector<8x32xf32>
    tpu.vector_store %arg18[%c0_74, %c0_75], %167 {strides = array<i32>} : memref<8x32xf32, #tpu.memory_space<vmem>>, vector<8x32xf32>,
    %c1_i32 = arith.constant 1 : i32
    %169 = arith.cmpi eq, %arg1, %c1_i32 : i32
    %170 = arith.extui %169 : i1 to i32
    %c0_i32_76 = arith.constant 0 : i32
    %171 = arith.cmpi ne, %170, %c0_i32_76 : i32
    scf.if %171 {
      %c0_77 = arith.constant 0 : index
      %c0_78 = arith.constant 0 : index
      %172 = vector.load %arg15[%c0_77, %c0_78] : memref<1x32xf32, #tpu.memory_space<vmem>>, vector<1x32xf32>
      %c0_79 = arith.constant 0 : index
      %c0_80 = arith.constant 0 : index
      %173 = vector.load %arg16[%c0_79, %c0_80] : memref<1x32xf32, #tpu.memory_space<vmem>>, vector<1x32xf32>
      %cst_81 = arith.constant dense<0.000000e+00> : vector<8xf32>
      %174 = vector.multi_reduction <add>, %167, %cst_81 [1] : vector<8x32xf32> to vector<8xf32>
      %175 = vector.shape_cast %174 : vector<8xf32> to vector<8x1xf32>
      %cst_82 = arith.constant 3.200000e+01 : f32
      %176 = vector.broadcast %cst_82 : f32 to vector<8x1xf32>
      %177 = arith.divf %175, %176 : vector<8x1xf32>
      %178 = vector.broadcast %177 : vector<8x1xf32> to vector<8x32xf32>
      %179 = arith.subf %167, %178 : vector<8x32xf32>
      %180 = arith.mulf %179, %179 : vector<8x32xf32>
      %cst_83 = arith.constant dense<0.000000e+00> : vector<8xf32>
      %181 = vector.multi_reduction <add>, %180, %cst_83 [1] : vector<8x32xf32> to vector<8xf32>
      %182 = vector.shape_cast %181 : vector<8xf32> to vector<8x1xf32>
      %cst_84 = arith.constant 3.200000e+01 : f32
      %183 = vector.broadcast %cst_84 : f32 to vector<8x1xf32>
      %184 = arith.divf %182, %183 : vector<8x1xf32>
      %185 = vector.broadcast %177 : vector<8x1xf32> to vector<8x32xf32>
      %186 = arith.subf %167, %185 : vector<8x32xf32>
      %cst_85 = arith.constant 9.99999974E-6 : f32
      %187 = vector.broadcast %cst_85 : f32 to vector<8x1xf32>
      %188 = arith.addf %184, %187 : vector<8x1xf32>
      %189 = math.rsqrt %188 : vector<8x1xf32>
      %190 = vector.broadcast %189 : vector<8x1xf32> to vector<8x32xf32>
      %191 = arith.mulf %186, %190 : vector<8x32xf32>
      %192 = vector.broadcast %172 : vector<1x32xf32> to vector<8x32xf32>
      %193 = arith.mulf %191, %192 : vector<8x32xf32>
      %194 = vector.broadcast %173 : vector<1x32xf32> to vector<8x32xf32>
      %195 = arith.addf %193, %194 : vector<8x32xf32>
      %196 = arith.truncf %195 : vector<8x32xf32> to vector<8x32xbf16>
      %c0_86 = arith.constant 0 : index
      %c0_87 = arith.constant 0 : index
      %197 = vector.load %arg17[%c0_86, %c0_87] : memref<8x32xbf16, #tpu.memory_space<vmem>>, vector<8x32xbf16>
      tpu.vector_store %arg17[%c0_86, %c0_87], %196 {strides = array<i32>} : memref<8x32xbf16, #tpu.memory_space<vmem>>, vector<8x32xbf16>,
    } else {
    }
    return
  }
  func.func @transform_0(%arg0: i32, %arg1: i32) -> (i32, i32) {
    %c0_i32 = arith.constant 0 : i32
    %c0_i32_0 = arith.constant 0 : i32
    return %arg0, %c0_i32 : i32, i32
  }
  func.func @transform_1(%arg0: i32, %arg1: i32) -> (i32, i32, i32) {
    %c0_i32 = arith.constant 0 : i32
    %c0_i32_0 = arith.constant 0 : i32
    %c0_i32_1 = arith.constant 0 : i32
    return %arg1, %c0_i32, %c0_i32_0 : i32, i32, i32
  }
  func.func @transform_2(%arg0: i32, %arg1: i32) -> (i32, i32, i32) {
    %c0_i32 = arith.constant 0 : i32
    %c0_i32_0 = arith.constant 0 : i32
    %c0_i32_1 = arith.constant 0 : i32
    return %arg1, %c0_i32, %c0_i32_0 : i32, i32, i32
  }
  func.func @transform_3(%arg0: i32, %arg1: i32) -> (i32, i32, i32) {
    %c0_i32 = arith.constant 0 : i32
    %c0_i32_0 = arith.constant 0 : i32
    %c0_i32_1 = arith.constant 0 : i32
    return %arg1, %c0_i32, %c0_i32_0 : i32, i32, i32
  }
  func.func @transform_4(%arg0: i32, %arg1: i32) -> (i32, i32, i32) {
    %c0_i32 = arith.constant 0 : i32
    %c0_i32_0 = arith.constant 0 : i32
    %c0_i32_1 = arith.constant 0 : i32
    return %arg1, %c0_i32, %c0_i32_0 : i32, i32, i32
  }
  func.func @transform_5(%arg0: i32, %arg1: i32) -> (i32, i32, i32) {
    %c0_i32 = arith.constant 0 : i32
    %c0_i32_0 = arith.constant 0 : i32
    %c0_i32_1 = arith.constant 0 : i32
    return %arg1, %c0_i32, %c0_i32_0 : i32, i32, i32
  }
  func.func @transform_6(%arg0: i32, %arg1: i32) -> (i32, i32, i32) {
    %c0_i32 = arith.constant 0 : i32
    %c0_i32_0 = arith.constant 0 : i32
    %c0_i32_1 = arith.constant 0 : i32
    return %arg1, %c0_i32, %c0_i32_0 : i32, i32, i32
  }
  func.func @transform_7(%arg0: i32, %arg1: i32) -> (i32, i32, i32) {
    %c0_i32 = arith.constant 0 : i32
    %c0_i32_0 = arith.constant 0 : i32
    %c0_i32_1 = arith.constant 0 : i32
    return %arg1, %c0_i32, %c0_i32_0 : i32, i32, i32
  }
  func.func @transform_8(%arg0: i32, %arg1: i32) -> (i32, i32, i32) {
    %c0_i32 = arith.constant 0 : i32
    %c0_i32_0 = arith.constant 0 : i32
    %c0_i32_1 = arith.constant 0 : i32
    return %arg1, %c0_i32, %c0_i32_0 : i32, i32, i32
  }
  func.func @transform_9(%arg0: i32, %arg1: i32) -> (i32, i32, i32) {
    %c0_i32 = arith.constant 0 : i32
    %c0_i32_0 = arith.constant 0 : i32
    %c0_i32_1 = arith.constant 0 : i32
    return %arg1, %c0_i32, %c0_i32_0 : i32, i32, i32
  }
  func.func @transform_10(%arg0: i32, %arg1: i32) -> (i32, i32, i32) {
    %c0_i32 = arith.constant 0 : i32
    %c0_i32_0 = arith.constant 0 : i32
    %c0_i32_1 = arith.constant 0 : i32
    return %arg1, %c0_i32, %c0_i32_0 : i32, i32, i32
  }
  func.func @transform_11(%arg0: i32, %arg1: i32) -> (i32, i32, i32) {
    %c0_i32 = arith.constant 0 : i32
    %c0_i32_0 = arith.constant 0 : i32
    %c0_i32_1 = arith.constant 0 : i32
    return %arg1, %c0_i32, %c0_i32_0 : i32, i32, i32
  }
  func.func @transform_12(%arg0: i32, %arg1: i32) -> (i32, i32, i32) {
    %c0_i32 = arith.constant 0 : i32
    %c0_i32_0 = arith.constant 0 : i32
    %c0_i32_1 = arith.constant 0 : i32
    return %arg1, %c0_i32, %c0_i32_0 : i32, i32, i32
  }
  func.func @transform_13(%arg0: i32, %arg1: i32) -> (i32, i32) {
    %c0_i32 = arith.constant 0 : i32
    %c0_i32_0 = arith.constant 0 : i32
    %c0_i32_1 = arith.constant 0 : i32
    return %c0_i32, %c0_i32_0 : i32, i32
  }
  func.func @transform_14(%arg0: i32, %arg1: i32) -> (i32, i32) {
    %c0_i32 = arith.constant 0 : i32
    %c0_i32_0 = arith.constant 0 : i32
    %c0_i32_1 = arith.constant 0 : i32
    return %c0_i32, %c0_i32_0 : i32, i32
  }
  func.func @transform_15(%arg0: i32, %arg1: i32) -> (i32, i32) {
    %c0_i32 = arith.constant 0 : i32
    %c0_i32_0 = arith.constant 0 : i32
    return %arg0, %c0_i32 : i32, i32
  }
}

</mosaic_0001>

<bundles_post_ra>
// kernel: _lambda_.3
= control target key start
LH: loop header
LB: loop body
LE: loop exit
PB: predicated region body
PF: predicated region fallthrough
CT: control target
= control target key end

     0   :  { %v167_v2 = vmov 0   ;;  %s221_s0 = inlined_call_operand.vmem [shape: bf16[16,32], index: 0, kind: input, shape index: {}]   ;;  %s222_s1 = inlined_call_operand.vmem [shape: bf16[32,256], index: 1, kind: input, shape index: {}]   ;;  %s223_s2 = inlined_call_operand.vmem [shape: f32[1,256], index: 2, kind: input, shape index: {}]   ;;  %s224_s3 = inlined_call_operand.hbm [shape: f32[16,256], index: 3, kind: output, shape index: {}]  }
   0x1   :  { %v136_v0 = vld [vmem:[%s222_s1 + $0x4] ss:$8 sps:$4 sm:$0xff]   ;;  %v138_v1 = vld [vmem:[%s222_s1] ss:$8 sps:$4 sm:$0xff]   ;;  %95 = vmatprep.mubr.bf16.mxu0 %v167_v2  ;;  %v139_v3 = vld [vmem:[%s222_s1 + $0x14] ss:$8 sps:$4 sm:$0xff]  }
   0x2   :  { %63 = vmatprep.subr.bf16.mxu0 %v136_v0  ;;  %v141_v4 = vld [vmem:[%s222_s1 + $0x10] ss:$8 sps:$4 sm:$0xff]  }
   0x3   :  { %64 = vmatpush1.bf16.msra.mxu0 %v138_v1 }
   0x4   :  { %65 = vmatprep.subr.bf16.mxu0 %v139_v3 }
   0x5   :  { %8 = vsyncpa [#allocation3], 0  ;;  %v142_v5 = vld [vmem:[%s221_s0] sm:$0xff]   ;;  %vm59_vm0 = vcmask 261120   ;;  %v24_v6 = vlaneseq  ;;  %s168_s1 = smov [#allocation2]  }
   0x6   :  { %v22_v9 = vld [vmem:[%s223_s2] sm:$0x3]  ;;  %s115_s24 = sshll.u32 %s168_s1, 4  ;;  %s116_s24 = int_to_ptr.vmem [resolvable:$true] %s115_s24 }
   0x7   :  { %66 = vmatpush1.bf16.msra.mxu0 %v141_v4  ;;  %v25_v7 = vshrl.u32 %v24_v6, 7  ;;  %s143_s0 = scalar_lea.vmem %s116_s24, 512  ;;  %p148_p1 = scmp.lt.s32.totalorder %s116_s24, %s116_s24 }
   0x8   :  { %p144_p0 = scmp.ne.s32.totalorder %s116_s24, %s143_s0  ;;  %p149_p2 = scmp.lt.s32.totalorder %s143_s0, %s143_s0 }
   0x9   :  { %v26_v8 = vsub.s32 0, %v25_v7  ;;  %v30_v10 = vsub.s32 1, %v25_v7 }
   0xa   :  { %131 = vmatmul.mubr.msk.bf16.vlgmr.msra.gmra.mrb[0].mxu0 %vm59_vm0, %v142_v5  ;;  %p150_p3 = por %p149_p2, %p148_p1 }
   0xb   :  { %v27_v11 = vrot.slane %v22_v9, %v26_v8  ;;  %v31_v12 = vrot.slane %v22_v9, %v30_v10 }
   0xc   :  { %p151_p4 = pnand %p150_p3, %p144_p0 }
  0xdd   :  { %v97_v13 = vpop.f32.mrb[0].mxu0 }
  0xde   :  { %v98_v14 = vadd.f32 %v97_v13, %v27_v11  ;;  %v99_v15 = vpop.f32.mrb[1].mxu0 }
  0xdf   :  { %v100_v16 = vadd.f32 %v99_v15, %v31_v12  ;;  %v101_v17 = vpop.f32.mrb[2].mxu0 }
  0xe0   :  { %106 = vst [vmem:[#allocation2] sm:$0xff] %v98_v14  ;;  %v102_v18 = vadd.f32 %v101_v17, %v27_v11  ;;  %v103_v19 = vpop.f32.mrb[3].mxu0 }
  0xe1   :  { %107 = vst [vmem:[#allocation2 + $0x8] sm:$0xff] %v100_v16  ;;  %v104_v20 = vadd.f32 %v103_v19, %v31_v12 }
  0xe2   :  { %108 = vst [vmem:[#allocation2 + $0x10] sm:$0xff] %v102_v18 }
  0xe3   :  { %109 = vst [vmem:[#allocation2 + $0x18] sm:$0xff] %v104_v20 }
  0xe4   :  { %154 = shalt.err (!%p151_p4)
}
  0xe5   :  { %s155_s26 = scalar_lea.hbm %s224_s3, 512 }
  0xe6   :  { %p156_p5 = scmp.ne.s32.totalorder %s224_s3, %s155_s26  ;;  %p159_p6 = scmp.lt.u32.totalorder %s155_s26, %s224_s3 }
  0xe8   :  { %p161_p7 = pnand %p159_p6, %p156_p5 }
  0xea   :  { %164 = shalt.err (!%p161_p7)
}
  0xeb   :  { %s169_s4 = smov 256   ;;  %s170_s5 = smov 16  }
  0xec   :  { %121 = dma.vmem_to_hbm [thread:$0]  %s116_s24, 512, %s224_s3, [#allocation3], %s169_s4, %s169_s4, %s170_s5  }
  0xed   :  { %165 = dma.done.wait [#allocation3], 512  }
  0xee   :  { %166 = vsyncadd [#allocation3], 4294966784 }
  0xef   :  { %125 = vsyncpa [#allocation3], 1 }

// kernel: _lambda_.2
= control target key start
LH: loop header
LB: loop body
LE: loop exit
PB: predicated region body
PF: predicated region fallthrough
CT: control target
= control target key end

     0   :  { %s2357_s18 = smov 0   ;;  %s2359_s19 = smov 0   ;;  %s2643_s0 = inlined_call_operand.vmem [shape: f32[16,32], index: 0, kind: input, shape index: {}]   ;;  %s2644_s1 = inlined_call_operand.vmem [shape: f32[2,1,32], index: 1, kind: input, shape index: {}]   ;;  %s2645_s2 = inlined_call_operand.vmem [shape: f32[2,1,32], index: 2, kind: input, shape index: {}]   ;;  %s2646_s3 = inlined_call_operand.vmem [shape: bf16[2,32,96], index: 3, kind: input, shape index: {}]   ;;  %s2647_s4 = inlined_call_operand.vmem [shape: f32[2,1,96], index: 4, kind: input, shape index: {}]   ;;  %s2648_s5 = inlined_call_operand.vmem [shape: bf16[2,32,32], index: 5, kind: input, shape index: {}]   ;;  %s2649_s6 = inlined_call_operand.vmem [shape: f32[2,1,32], index: 6, kind: input, shape index: {}]   ;;  %s2650_s7 = inlined_call_operand.vmem [shape: f32[2,1,32], index: 7, kind: input, shape index: {}]   ;;  %s2651_s8 = inlined_call_operand.vmem [shape: f32[2,1,32], index: 8, kind: input, shape index: {}]   ;;  %s2652_s9 = inlined_call_operand.vmem [shape: bf16[2,32,128], index: 9, kind: input, shape index: {}]   ;;  %s2653_s10 = inlined_call_operand.vmem [shape: f32[2,1,128], index: 10, kind: input, shape index: {}]   ;;  %s2654_s11 = inlined_call_operand.vmem [shape: bf16[2,128,32], index: 11, kind: input, shape index: {}]   ;;  %s2655_s12 = inlined_call_operand.vmem [shape: f32[2,1,32], index: 12, kind: input, shape index: {}]   ;;  %s2656_s13 = inlined_call_operand.vmem [shape: f32[1,32], index: 13, kind: input, shape index: {}]   ;;  %s2657_s14 = inlined_call_operand.vmem [shape: f32[1,32], index: 14, kind: input, shape index: {}]   ;;  %s2658_s15 = inlined_call_operand.vmem [shape: bf16[16,32], index: 15, kind: output, shape index: {}]  }
   0x1   :  { %2663 = sst [smem:[#allocation9_spill]] %s2643_s0  ;;  %s2361_s20 = smov 0  }
   0x2   :  { %2664 = sst [smem:[#allocation10_spill]] %s2646_s3  ;;  %s2363_s21 = smov 0  }
   0x3   :  { %2665 = sst [smem:[#allocation11_spill]] %s2648_s5  ;;  %s2365_s22 = smov 0  }
   0x4   :  { %2666 = sst [smem:[#allocation12_spill]] %s2650_s7 }
   0x5   :  { %2667 = sst [smem:[#allocation13_spill]] %s2654_s11 }
   0x6   :  { %2668 = sst [smem:[#allocation14_spill]] %s2656_s13 }
   0x7   :  { %2669 = sst [smem:[#allocation15_spill]] %s2657_s14 }
   0x8   :  { %2670 = sst [smem:[#allocation16_spill]] %s2658_s15 }
   0x9 LB: > { %2671 = sst [smem:[#allocation3_spill]] %s2256_s18  ;;  %s34_s23 = sadd.s32 1, %s2264_s20  ;;  %s2272_s22 = sphi %s2365_s22, %s25_s22   ;;  %s2268_s21 = sphi %s2363_s21, %s2698_s21   ;;  %s2264_s20 = sphi %s2361_s20, %s2697_s20   ;;  %s2260_s19 = sphi %s2359_s19, %s2696_s19   ;;  %s2256_s18 = sphi %s2357_s18, %s2695_s18  }
   0xa   : > { %2672 = sst [smem:[#allocation4_spill]] %s2264_s20  ;;  %s37_s24 = sadd.s32 1, %s2268_s21 }
   0xb   : > { %2673 = sst [smem:[#allocation5_spill]] %s2268_s21  ;;  %p35_p0 = scmp.ge.s32.totalorder %s34_s23, 2 }
   0xc   : > { %2674 = sst [smem:[#allocation6_spill]] %s2272_s22  ;;  %p1971_p1 = scmp.ge.s32.totalorder %s2272_s22, 1 }
   0xd   : > { %p552_p2 = scmp.lt.s32.totalorder %s2272_s22, 5  ;;  %s2700_s23 = smov (%p35_p0, %s34_s23), 0 }
   0xe   : > { %2675 = sst [smem:[#allocation7_spill]] %s2700_s23  ;;  %s2702_s24 = smov (!%p35_p0, %s37_s24), %s2268_s21 }
   0xf   : > { %p553_p3 = pnand %p1971_p1, %p552_p2  ;;  %p39_p4 = scmp.ge.s32.totalorder %s2702_s24, 2 }
  0x10   : > { %p642_p5 = scmp.lt.s32.totalorder (!%p553_p3), %s2260_s19, 1  ;;  %p646_p6 = scmp.lt.s32.totalorder (!%p553_p3), %s2256_s18, 1 }
  0x11   : > { %s2704_s24 = smov (%p39_p4, %s2702_s24), 0  ;;  %556 = sbr.rel (%p553_p3) target bundleno = 3050 (0xbea), region = 80 }
  0x12   : > { %2676 = sst [smem:[#allocation8_spill]] %s2704_s24  ;;  %s2677_s0 = sld [smem:[#allocation9_spill]] (!%p553_p3) }
  0x13   : > { %s2678_s3 = sld [smem:[#allocation10_spill]] (!%p553_p3)  ;;  %s2679_s5 = sld [smem:[#allocation11_spill]] (!%p553_p3) }
  0x14   : > { %s2681_s24 = sld [smem:[#allocation13_spill]] (!%p553_p3) }
  0x18   : > { %s2706_s19 = smov (!%p642_p5, %s2260_s19), 1 }
  0x19   : > { %s2391_s25 = scalar_select %p646_p6, %s2256_s18, 1 }
  0x1a   : > { %s1972_s26 = sshll.u32 %s2706_s19, 3  ;;  %s1981_s27 = sshll.u32 %s2706_s19, 2 }
  0x1b   : > { %s645_s30 = scalar_lea.vmem %s2677_s0, %s1972_s26  ;;  %s2021_s22 = sshll.u32 %s2391_s25, 4 }
  0x1c   : > { %s2408_s18 = scalar_lea.vmem %s2678_s3, %s2021_s22  ;;  %s2417_s29 = scalar_lea.vmem %s2679_s5, %s2021_s22 }
  0x1d   : > { %s2434_s19 = scalar_lea.vmem %s2652_s9, %s2021_s22  ;;  %s681_s11 = scalar_lea.vmem %s2653_s10, %s2391_s25 }
  0x1e   : > { %s2024_s5 = sshll.u32 %s2391_s25, 6  ;;  %s689_s21 = scalar_lea.vmem %s2655_s12, %s2391_s25 }
  0x1f   : > { %s2448_s7 = scalar_lea.vmem %s2681_s24, %s2024_s5  ;;  %s2682_s0 = sld [smem:[#allocation16_spill]] }
  0x20   : > { %s2683_s22 = sld [smem:[#allocation3_spill]] }
  0x25   : > { %s2453_s3 = scalar_lea.vmem %s2682_s0, %s1981_s27 }
  0x26   : > { %p1982_p7 = scmp.ne.s32.totalorder %s2683_s22, 0 }
  0x27   : > { %v699_v0 = vld [vmem:[%s645_s30] sm:$0xff] (!%p1982_p7)  ;;  %vm700_vm0 = vcmask (!%p1982_p7), 261120  }
  0x28   : > { %698 = sbr.rel (%p1982_p7) target bundleno = 47 (0x2f), region = 84  ;;  %701 = vst.msk [vmem:[#allocation2] sm:$0xff] (!%p1982_p7), %vm700_vm0, %v699_v0 }
  0x2f PF: > { %v2456_v1 = vld [vmem:[#allocation2] sm:$0xff]  ;;  %vm705_vm1 = vcmask 261120   ;;  %v2274_v9 = vmov 0.0   ;;  %vm2275_vm2 = vmmov 0   ;;  %v2195_v10 = vld [vmem:[%s2408_s18 + $0x8] sm:$0xff]   ;;  %s2685_s30 = scalar_lea.vmem %s2645_s2, %s2391_s25  ;;  %s2686_s26 = scalar_lea.vmem %s2647_s4, %s2391_s25  ;;  %vm982_vm3 = vcmask 1043456  }
  0x30   : > { %v706_v2 = vsel %vm705_vm1, %v2456_v1, 0.0  ;;  %v2194_v8 = vld [vmem:[%s2408_s18] sm:$0xff]   ;;  %2059 = vmatprep.subr.bf16.mxu1 %v2274_v9  ;;  %2063 = vmatprep.mubr.msk.bf16.mxu1 %vm2275_vm2, %v2274_v9  ;;  %s2684_s18 = scalar_lea.vmem %s2644_s1, %s2391_s25  ;;  %vm978_vm4 = vcmask 64512   ;;  %v801_v59 = vlaneseq  ;;  %s2687_s17 = scalar_lea.vmem %s2649_s6, %s2391_s25 }
  0x31   : > { %707 = vadd.xlane.f32.xlu0 %v706_v2  ;;  %2060 = vmatpush3.bf16.msra.mxu1 %v2194_v8  ;;  %v1983_v15 = vld [vmem:[%s2684_s18] ss:$0 sm:$0xff]  ;;  %s2688_s13 = sld [smem:[#allocation12_spill]]  ;;  %s2690_s5 = scalar_lea.vmem %s2651_s8, %s2391_s25 }
  0x32   : > { %2079 = vmatprep.subr.bf16.mxu0 %v2274_v9  ;;  %2061 = vmatprep.subr.bf16.mxu1 %v2274_v9  ;;  %v1984_v17 = vld [vmem:[%s2685_s30] ss:$0 sm:$0xff]  ;;  %v802_v60 = vshrl.u32 %v801_v59, 7  ;;  %v804_v61 = vand.u32 127, %v801_v59  ;;  %s2691_s24 = sld [smem:[#allocation3_spill]] }
  0x33   : > { %2081 = vmatprep.mubr.msk.bf16.mxu0 %vm2275_vm2, %v2274_v9  ;;  %v1985_v21 = vld [vmem:[%s2686_s26] ss:$0 sm:$0xff] }
  0x34   : > { %vm805_vm5 = vcmp.ge.s32.totalorder %v802_v60, %v804_v61 }
  0x35   : > { %2062 = vmatpush3.bf16.msra.mxu1 %v2195_v10 }
  0x36   : > { %2067 = vmatprep.subr.bf16.mxu1 %v2274_v9 }
  0x37   : > { %s2689_s14 = scalar_lea.vmem %s2688_s13, %s2391_s25 }
  0x38   : > { %p2016_p8 = scmp.ne.s32.totalorder %s2691_s24, 1 }
  0x39   : > { %s2692_s27 = sld [smem:[#allocation14_spill]] (!%p2016_p8)  ;;  %s2693_s28 = sld [smem:[#allocation15_spill]] (!%p2016_p8)  ;;  %vm1781_vm7 = vcmask (!%p2016_p8), 257024  }
  0xbe   : > { %v708_v3 = vpop.xlane.xlu0 %707 }
  0xbf   : > { %v710_v4 = vmul.f32 0.03125, %v708_v3 }
  0xc1   : > { %v711_v5 = vsub.f32 %v2456_v1, %v710_v4 }
  0xc3   : > { %v712_v6 = vmul.f32 %v711_v5, %v711_v5 }
  0xc5   : > { %v713_v7 = vsel %vm705_vm1, %v712_v6, 0.0 }
  0xc6   : > { %714 = vadd.xlane.f32.xlu0 %v713_v7 }
 0x153   : > { %v715_v11 = vpop.xlane.xlu0 %714 }
 0x154   : > { %v716_v12 = vmul.f32 0.03125, %v715_v11 }
 0x156   : > { %v717_v13 = vadd.f32 1e-05, %v716_v12 }
 0x158   : > { %2208 = vrsqrt.f32 %v717_v13 }
 0x162   : > { %v2209_v14 = vpop.eup %2208 }
 0x163   : > { %v719_v16 = vmul.f32 %v2209_v14, %v711_v5 }
 0x165   : > { %v726_v18 = vmul.f32 %v1983_v15, %v719_v16 }
 0x167   : > { %v733_v19 = vadd.f32 %v1984_v17, %v726_v18 }
 0x169   : > { %v734_v20 = vpack.c.bf16 %v733_v19, %v733_v19 }
 0x16b   : > { %2064 = vmatmul.mubr.msk.bf16.vlgmr.msra.gmra.mrb[0].mxu1 %vm705_vm1, %v734_v20 }
 0x16c   : > { %2069 = vmatprep.mubr.msk.bf16.mxu1 %vm2275_vm2, %v2274_v9 }
 0x23e   : > { %v795_v22 = vpop.f32.mrb[0].mxu1 }
 0x23f   : > { %v2065_v23 = vpop.f32.mrb[1].mxu1  ;;  %v796_v24 = vadd.f32 %v1985_v21, %v795_v22 }
 0x240   : > { %v798_v25 = vpop.f32.mrb[2].mxu1 }
 0x241   : > { %806 = vxpose.xlu1.b32.start.end [1/1] (short) (narrow) %v796_v24, 96  ;;  %v2066_v26 = vpop.f32.mrb[3].mxu1 }
 0x2c1   : > { %v822_v27 = vpop.trf.xlu1 }
 0x2c2   : > { %838 = vxpose.xlu1.b32.start.end [1/1] (short) (narrow) %v822_v27, 8 }
 0x2c5   : > { %v823_v28 = vpop.trf.xlu1 }
 0x2c6   : > { %870 = vxpose.xlu0.b32.start.end [1/1] (short) (narrow) %v823_v28, 8 }
 0x2c9   : > { %v824_v29 = vpop.trf.xlu1 }
 0x2ca   : > { %902 = vxpose.xlu1.b32.start.end [1/1] (short) (narrow) %v824_v29, 8 }
 0x2cd   : > { %v825_v30 = vpop.trf.xlu1 }
 0x2ce   : > { %934 = vxpose.xlu0.b32.start.end [1/1] (short) (narrow) %v825_v30, 8 }
 0x2d1   : > { %v826_v31 = vpop.trf.xlu1 }
 0x2d2   : > { %v974_v32 = vpack.c.bf16 %v826_v31, %v826_v31 }
 0x2d4   : > { %v984_v33 = vsel %vm982_vm3, %v974_v32, 0 }
 0x2d5   : > { %2068 = vmatpush3.bf16.msra.mxu1 %v984_v33  ;;  %v827_v34 = vpop.trf.xlu1 }
 0x2d6   : > { %v975_v35 = vpack.c.bf16 %v827_v34, %v827_v34  ;;  %2073 = vmatprep.subr.bf16.mxu1 %v2274_v9 }
 0x2d8   : > { %v1030_v36 = vsel %vm982_vm3, %v975_v35, 0 }
 0x2d9   : > { %v828_v37 = vpop.trf.xlu1 }
 0x2da   : > { %v976_v38 = vpack.c.bf16 %v828_v37, %v828_v37 }
 0x2dc   : > { %v1076_v39 = vsel %vm982_vm3, %v976_v38, 0 }
 0x2dd   : > { %2080 = vmatpush3.bf16.msra.mxu0 %v1076_v39  ;;  %v829_v40 = vpop.trf.xlu1 }
 0x2de   : > { %2091 = vmatprep.subr.bf16.mxu0 %v2274_v9  ;;  %v977_v51 = vpack.c.bf16 %v829_v40, %v829_v40 }
 0x2e0   : > { %v1122_v56 = vsel %vm982_vm3, %v977_v51, 0 }
 0x2e1   : > { %v2495_v41 = vpop.trf.xlu1 }
 0x2e2   : > { %v1218_v60 = vpack.c.bf16 %v2495_v41, %v2495_v41 }
 0x2e5   : > { %v2497_v42 = vpop.trf.xlu1 }
 0x2e9   : > { %v2499_v43 = vpop.trf.xlu1 }
 0x2ed   : > { %v2501_v44 = vpop.trf.xlu1 }
 0x342   : > { %v854_v45 = vpop.trf.xlu1 }
 0x343   : > { %v966_v46 = vmul.f32 0.35355338, %v854_v45 }
 0x345   : > { %v970_v47 = vpack.c.bf16 %v966_v46, %v966_v46 }
 0x346   : > { %v886_v48 = vpop.trf.xlu0 }
 0x347   : > { %2070 = vmatmul.mubr.msk.bf16.vlgmr.msra.gmra.mrb[4].mxu1 %vm978_vm4, %v970_v47  ;;  %v967_v49 = vmul.f32 0.35355338, %v886_v48 }
 0x348   : > { %2074 = vmatpush3.bf16.msra.mxu1 %v1030_v36  ;;  %2075 = vmatprep.mubr.msk.bf16.mxu1 %vm2275_vm2, %v2274_v9 }
 0x349   : > { %2085 = vmatprep.subr.bf16.mxu1 %v2274_v9  ;;  %v971_v52 = vpack.c.bf16 %v967_v49, %v967_v49 }
 0x34a   : > { %v918_v50 = vpop.trf.xlu1 }
 0x34b   : > { %v968_v53 = vmul.f32 0.35355338, %v918_v50 }
 0x34d   : > { %v972_v54 = vpack.c.bf16 %v968_v53, %v968_v53 }
 0x34e   : > { %v950_v55 = vpop.trf.xlu0 }
 0x34f   : > { %2076 = vmatmul.mubr.msk.bf16.vlgmr.msra.gmra.mrb[8].mxu1 %vm978_vm4, %v971_v52  ;;  %2082 = vmatmul.mubr.msk.bf16.vlgmr.msra.gmra.mrb[0].mxu0 %vm978_vm4, %v972_v54  ;;  %v969_v57 = vmul.f32 0.35355338, %v950_v55 }
 0x350   : > { %2086 = vmatpush3.bf16.msra.mxu1 %v1122_v56  ;;  %2087 = vmatprep.mubr.msk.bf16.mxu1 %vm2275_vm2, %v2274_v9 }
 0x351   : > { %2093 = vmatprep.mubr.msk.bf16.mxu0 %vm2275_vm2, %v2274_v9  ;;  %2097 = vmatprep.subr.bf16.mxu1 %v2274_v9  ;;  %v973_v58 = vpack.c.bf16 %v969_v57, %v969_v57 }
 0x357   : > { %2088 = vmatmul.mubr.msk.bf16.vlgmr.msra.gmra.mrb[12].mxu1 %vm978_vm4, %v973_v58 }
 0x358   : > { %2099 = vmatprep.mubr.msk.bf16.mxu1 %vm2275_vm2, %v2274_v9 }
 0x41a   : > { %v1020_v62 = vpop.f32.mrb[4].mxu1 }
 0x41b   : > { %v1166_v63 = vsel %vm805_vm5, %v1020_v62, -1e+10  ;;  %v2071_v0 = vpop.f32.mrb[5].mxu1 }
 0x41c   : > { %v1023_v2 = vpop.f32.mrb[6].mxu1  ;;  %v1170_v3 = vsel %vm978_vm4, %v1166_v63, -inf }
 0x41d   : > { %1171 = vmax.xlane.f32.xlu1 %v1170_v3  ;;  %v2072_v4 = vpop.f32.mrb[7].mxu1  ;;  %v1220_v3 = vpack.c.bf16 %v2499_v43, %v2499_v43  ;;  %v1221_v43 = vpack.c.bf16 %v2501_v44, %v2501_v44 }
 0x422   : > { %v1066_v5 = vpop.f32.mrb[8].mxu1  ;;  %v1112_v6 = vpop.f32.mrb[0].mxu0 }
 0x423   : > { %v1167_v7 = vsel %vm805_vm5, %v1066_v5, -1e+10  ;;  %v1168_v8 = vsel %vm805_vm5, %v1112_v6, -1e+10  ;;  %v2077_v10 = vpop.f32.mrb[9].mxu1  ;;  %v2083_v11 = vpop.f32.mrb[1].mxu0  ;;  %v1219_v5 = vpack.c.bf16 %v2497_v42, %v2497_v42 }
 0x424   : > { %v1069_v12 = vpop.f32.mrb[10].mxu1  ;;  %v1115_v13 = vpop.f32.mrb[2].mxu0  ;;  %v1176_v14 = vsel %vm978_vm4, %v1168_v8, -inf  ;;  %v1173_v15 = vsel %vm978_vm4, %v1167_v7, -inf  ;;  %v2196_v42 = vld [vmem:[%s2417_s29] sm:$0xff]  }
 0x425   : > { %1177 = vmax.xlane.f32.xlu1 %v1176_v14  ;;  %1174 = vmax.xlane.f32.xlu0 %v1173_v15  ;;  %v2078_v16 = vpop.f32.mrb[11].mxu1  ;;  %v2084_v17 = vpop.f32.mrb[3].mxu0 }
 0x42a   : > { %v1158_v18 = vpop.f32.mrb[12].mxu1 }
 0x42b   : > { %v1169_v19 = vsel %vm805_vm5, %v1158_v18, -1e+10  ;;  %v2089_v20 = vpop.f32.mrb[13].mxu1 }
 0x42c   : > { %v1161_v21 = vpop.f32.mrb[14].mxu1  ;;  %v1179_v22 = vsel %vm978_vm4, %v1169_v19, -inf }
 0x42d   : > { %1180 = vmax.xlane.f32.xlu1 %v1179_v22  ;;  %v2090_v23 = vpop.f32.mrb[15].mxu1 }
 0x4aa   : > { %v1172_v24 = vpop.xlane.xlu1 %1171 }
 0x4ab   : > { %v1182_v25 = vsub.f32 %v1166_v63, %v1172_v24 }
 0x4ad   : > { %v1186_v26 = vmul.f32 1.442695, %v1182_v25 }
 0x4af   : > { %2210 = vpow2.f32 %v1186_v26  ;;  %v1997_v26 = vld [vmem:[%s2687_s17] ss:$0 sm:$0xff] }
 0x4b2   : > { %v1178_v27 = vpop.xlane.xlu1 %1177  ;;  %v1175_v28 = vpop.xlane.xlu0 %1174 }
 0x4b3   : > { %v1184_v29 = vsub.f32 %v1168_v8, %v1178_v27  ;;  %v1183_v30 = vsub.f32 %v1167_v7, %v1175_v28  ;;  %v2197_v7 = vld [vmem:[%s2417_s29 + $0x8] sm:$0xff]  }
 0x4b5   : > { %v1190_v31 = vmul.f32 1.442695, %v1184_v29  ;;  %v1188_v32 = vmul.f32 1.442695, %v1183_v30 }
 0x4b7   : > { %2212 = vpow2.f32 %v1190_v31 }
 0x4b8   : > { %2214 = vpow2.f32 %v1188_v32 }
 0x4b9   : > { %v2211_v33 = vpop.eup %2210 }
 0x4ba   : > { %v1181_v34 = vpop.xlane.xlu1 %1180  ;;  %v1194_v35 = vsel %vm978_vm4, %v2211_v33, 0.0 }
 0x4bb   : > { %v1185_v36 = vsub.f32 %v1169_v19, %v1181_v34  ;;  %1195 = vadd.xlane.f32.xlu1 %v1194_v35 }
 0x4bd   : > { %v1192_v37 = vmul.f32 1.442695, %v1185_v36 }
 0x4bf   : > { %2216 = vpow2.f32 %v1192_v37 }
 0x4c1   : > { %v2213_v38 = vpop.eup %2212 }
 0x4c2   : > { %v2215_v39 = vpop.eup %2214  ;;  %v1200_v40 = vsel %vm978_vm4, %v2213_v38, 0.0 }
 0x4c3   : > { %v1197_v45 = vsel %vm978_vm4, %v2215_v39, 0.0  ;;  %1201 = vadd.xlane.f32.xlu1 %v1200_v40 }
 0x4c4   : > { %1198 = vadd.xlane.f32.xlu0 %v1197_v45 }
 0x4c9   : > { %v2217_v46 = vpop.eup %2216 }
 0x4ca   : > { %v1203_v47 = vsel %vm978_vm4, %v2217_v46, 0.0 }
 0x4cb   : > { %1204 = vadd.xlane.f32.xlu0 %v1203_v47 }
 0x548   : > { %v1196_v48 = vpop.xlane.xlu1 %1195 }
 0x549   : > { %2218 = vrcp.f32 %v1196_v48  ;;  %v2001_v48 = vld [vmem:[%s2689_s14] ss:$0 sm:$0xff] }
 0x550   : > { %v1202_v49 = vpop.xlane.xlu1 %1201 }
 0x551   : > { %v1199_v50 = vpop.xlane.xlu0 %1198  ;;  %2220 = vrcp.f32 %v1202_v49 }
 0x552   : > { %2222 = vrcp.f32 %v1199_v50  ;;  %v2002_v50 = vld [vmem:[%s2690_s5] ss:$0 sm:$0xff] }
 0x553   : > { %v2219_v51 = vpop.eup %2218 }
 0x554   : > { %v1214_v52 = vmul.f32 %v2219_v51, %v2211_v33 }
 0x556   : > { %v1222_v53 = vpack.c.bf16 %v1214_v52, %v1214_v52 }
 0x558   : > { %v1205_v54 = vpop.xlane.xlu0 %1204  ;;  %v1230_v55 = vsel %vm978_vm4, %v1222_v53, 0 }
 0x559   : > { %2224 = vrcp.f32 %v1205_v54  ;;  %2092 = vmatpush3.bf16.xpose.msra.mxu0 %v1230_v55  ;;  %v2200_v54 = vld [vmem:[%s2448_s7] sm:$0xff]   ;;  %v2201_v55 = vld [vmem:[%s2448_s7 + $0x8] sm:$0xff]  }
 0x55a   : > { %2103 = vmatprep.subr.bf16.mxu0 %v2274_v9 }
 0x55b   : > { %v2221_v56 = vpop.eup %2220 }
 0x55c   : > { %v2223_v57 = vpop.eup %2222  ;;  %v1216_v58 = vmul.f32 %v2221_v56, %v2213_v38  ;;  %v2202_v56 = vld [vmem:[%s2448_s7 + $0x10] sm:$0xff]  }
 0x55d   : > { %v1215_v59 = vmul.f32 %v2223_v57, %v2215_v39  ;;  %v2198_v39 = vld [vmem:[%s2434_s19] sm:$0xff]   ;;  %v2203_v57 = vld [vmem:[%s2448_s7 + $0x18] sm:$0xff]  }
 0x55e   : > { %v1224_v61 = vpack.c.bf16 %v1216_v58, %v1216_v58  ;;  %v2204_v58 = vld [vmem:[%s2448_s7 + $0x20] sm:$0xff]  }
 0x55f   : > { %v1223_v62 = vpack.c.bf16 %v1215_v59, %v1215_v59  ;;  %v2205_v59 = vld [vmem:[%s2448_s7 + $0x28] sm:$0xff]  }
 0x560   : > { %2094 = vmatmul.mubr.msk.bf16.vlgmr.msra.gmra.mrb[4].mxu0 %vm978_vm4, %v1218_v60  ;;  %v1322_v63 = vsel %vm978_vm4, %v1224_v61, 0  ;;  %v2206_v60 = vld [vmem:[%s2448_s7 + $0x30] sm:$0xff]   ;;  %v2207_v61 = vld [vmem:[%s2448_s7 + $0x38] sm:$0xff]  }
 0x561   : > { %v1276_v0 = vsel %vm978_vm4, %v1223_v62, 0  ;;  %2104 = vmatpush3.bf16.xpose.msra.mxu0 %v1322_v63  ;;  %2105 = vmatprep.mubr.msk.bf16.mxu0 %vm2275_vm2, %v2274_v9  ;;  %v2003_v62 = vld [vmem:[%s681_s11] ss:$0 sm:$0xff] }
 0x562   : > { %2098 = vmatpush3.bf16.xpose.msra.mxu1 %v1276_v0  ;;  %2115 = vmatprep.subr.bf16.mxu0 %v2274_v9 }
 0x563   : > { %v2225_v2 = vpop.eup %2224  ;;  %2109 = vmatprep.subr.bf16.mxu1 %v2274_v9 }
 0x564   : > { %v1217_v41 = vmul.f32 %v2225_v2, %v2217_v46 }
 0x566   : > { %v1225_v4 = vpack.c.bf16 %v1217_v41, %v1217_v41 }
 0x568   : > { %2106 = vmatmul.mubr.msk.bf16.vlgmr.msra.gmra.mrb[8].mxu0 %vm978_vm4, %v1220_v3  ;;  %v1368_v6 = vsel %vm978_vm4, %v1225_v4, 0 }
 0x569   : > { %2100 = vmatmul.mubr.msk.bf16.vlgmr.msra.gmra.mrb[16].mxu1 %vm978_vm4, %v1219_v5  ;;  %2119 = vmatprep.mubr.msk.bf16.mxu0 %vm2275_vm2, %v2274_v9 }
 0x56a   : > { %2110 = vmatpush3.bf16.xpose.msra.mxu1 %v1368_v6  ;;  %2111 = vmatprep.mubr.msk.bf16.mxu1 %vm2275_vm2, %v2274_v9 }
 0x56b   : > { %2123 = vmatprep.subr.bf16.mxu1 %v2274_v9  ;;  %2116 = vmatpush3.bf16.msra.mxu0 %v2196_v42 }
 0x56c   : > { %2117 = vmatprep.subr.bf16.mxu0 %v2274_v9 }
 0x56f   : > { %2118 = vmatpush3.bf16.msra.mxu0 %v2197_v7 }
 0x570   : > { %2131 = vmatprep.subr.bf16.mxu0 %v2274_v9 }
 0x571   : > { %2112 = vmatmul.mubr.msk.bf16.vlgmr.msra.gmra.mrb[20].mxu1 %vm978_vm4, %v1221_v43 }
 0x572   : > { %2127 = vmatprep.mubr.msk.bf16.mxu1 %vm2275_vm2, %v2274_v9  ;;  %2124 = vmatpush3.bf16.msra.mxu1 %v2198_v39 }
 0x573   : > { %2125 = vmatprep.subr.bf16.mxu1 %v2274_v9 }
 0x633   : > { %v1266_v8 = vpop.f32.mrb[4].mxu0 }
 0x634   : > { %1410 = vxpose.xlu1.b32.start [1/4] (short) (narrow) %v1266_v8, 8  ;;  %v2095_v10 = vpop.f32.mrb[5].mxu0 }
 0x635   : > { %v1269_v11 = vpop.f32.mrb[6].mxu0 }
 0x636   : > { %v2096_v12 = vpop.f32.mrb[7].mxu0 }
 0x63b   : > { %v1358_v13 = vpop.f32.mrb[8].mxu0 }
 0x63c   : > { %v1312_v44 = vpop.f32.mrb[16].mxu1  ;;  %v2107_v14 = vpop.f32.mrb[9].mxu0 }
 0x63d   : > { %1411 = vxpose.xlu1.b32.cont [2/4] (short) (narrow) %v1312_v44, 8  ;;  %v2101_v15 = vpop.f32.mrb[17].mxu1  ;;  %v1361_v16 = vpop.f32.mrb[10].mxu0 }
 0x63e   : > { %v1315_v17 = vpop.f32.mrb[18].mxu1  ;;  %v2108_v18 = vpop.f32.mrb[11].mxu0 }
 0x63f   : > { %v2102_v19 = vpop.f32.mrb[19].mxu1 }
 0x641   : > { %1412 = vxpose.xlu1.b32.cont [3/4] (short) (narrow) %v1358_v13, 8 }
 0x644   : > { %v1404_v20 = vpop.f32.mrb[20].mxu1 }
 0x645   : > { %1413 = vxpose.xlu1.b32.end [4/4] (short) (narrow) %v1404_v20, 8  ;;  %v2113_v21 = vpop.f32.mrb[21].mxu1 }
 0x646   : > { %v1407_v22 = vpop.f32.mrb[22].mxu1  ;;  %v2276_v21 = vmov -1.0  }
 0x647   : > { %v2114_v23 = vpop.f32.mrb[23].mxu1 }
 0x6b9   : > { %v1426_v24 = vpop.trf.xlu1 }
 0x6ba   : > { %v1442_v25 = vpack.c.bf16 %v1426_v24, %v1426_v24 }
 0x6bc   : > { %2120 = vmatmul.mubr.msk.bf16.vlgmr.msra.gmra.mrb[12].mxu0 %vm705_vm1, %v1442_v25 }
 0x6bd   : > { %2147 = vmatprep.mubr.msk.bf16.mxu0 %vm2275_vm2, %v2274_v9  ;;  %2132 = vmatpush3.bf16.msra.mxu0 %v2200_v54 }
 0x6be   : > { %2133 = vmatprep.subr.bf16.mxu0 %v2274_v9 }
 0x6c1   : > { %2134 = vmatpush3.bf16.msra.mxu0 %v2201_v55 }
 0x6c2   : > { %2135 = vmatprep.subr.bf16.mxu0 %v2274_v9 }
 0x6c5   : > { %2136 = vmatpush3.bf16.msra.mxu0 %v2202_v56 }
 0x6c6   : > { %2137 = vmatprep.subr.bf16.mxu0 %v2274_v9 }
 0x6c9   : > { %2138 = vmatpush3.bf16.msra.mxu0 %v2203_v57 }
 0x6ca   : > { %2139 = vmatprep.subr.bf16.mxu0 %v2274_v9 }
 0x6cd   : > { %2140 = vmatpush3.bf16.msra.mxu0 %v2204_v58 }
 0x6ce   : > { %2141 = vmatprep.subr.bf16.mxu0 %v2274_v9 }
 0x6d1   : > { %2142 = vmatpush3.bf16.msra.mxu0 %v2205_v59 }
 0x6d2   : > { %2143 = vmatprep.subr.bf16.mxu0 %v2274_v9 }
 0x6d5   : > { %2144 = vmatpush3.bf16.msra.mxu0 %v2206_v60 }
 0x6d6   : > { %2145 = vmatprep.subr.bf16.mxu0 %v2274_v9 }
 0x6d9   : > { %2146 = vmatpush3.bf16.msra.mxu0 %v2207_v61 }
 0x78f   : > { %v1503_v27 = vpop.f32.mrb[12].mxu0 }
 0x790   : > { %v1504_v28 = vadd.f32 %v1997_v26, %v1503_v27  ;;  %v2121_v29 = vpop.f32.mrb[13].mxu0 }
 0x791   : > { %v1506_v30 = vpop.f32.mrb[14].mxu0 }
 0x792   : > { %v2571_v31 = vadd.f32 %v1504_v28, %v2456_v1  ;;  %v2122_v32 = vpop.f32.mrb[15].mxu0  ;;  %v2199_v1 = vld [vmem:[%s2434_s19 + $0x8] sm:$0xff]   ;;  %v2007_v28 = vld [vmem:[%s689_s21] ss:$0 sm:$0xff] }
 0x793   : > { %2126 = vmatpush3.bf16.msra.mxu1 %v2199_v1 }
 0x794   : > { %v1512_v33 = vsel %vm705_vm1, %v2571_v31, 0.0 }
 0x795   : > { %1513 = vadd.xlane.f32.xlu0 %v1512_v33 }
 0x822   : > { %v1514_v34 = vpop.xlane.xlu0 %1513 }
 0x823   : > { %v1515_v35 = vmul.f32 0.03125, %v1514_v34 }
 0x825   : > { %v1516_v36 = vsub.f32 %v2571_v31, %v1515_v35 }
 0x827   : > { %v1517_v37 = vmul.f32 %v1516_v36, %v1516_v36 }
 0x829   : > { %v1518_v38 = vsel %vm705_vm1, %v1517_v37, 0.0 }
 0x82a   : > { %1519 = vadd.xlane.f32.xlu0 %v1518_v38 }
 0x8b7   : > { %v1520_v40 = vpop.xlane.xlu0 %1519 }
 0x8b8   : > { %v1521_v45 = vmul.f32 0.03125, %v1520_v40 }
 0x8ba   : > { %v1522_v46 = vadd.f32 1e-05, %v1521_v45 }
 0x8bc   : > { %2226 = vrsqrt.f32 %v1522_v46 }
 0x8c6   : > { %v2227_v47 = vpop.eup %2226 }
 0x8c7   : > { %v1524_v49 = vmul.f32 %v2227_v47, %v1516_v36 }
 0x8c9   : > { %v1531_v51 = vmul.f32 %v2001_v48, %v1524_v49  ;;  %v2017_v48 = vld [vmem:[%s2692_s27] ss:$0 sm:$0xff] (!%p2016_p8) }
 0x8cb   : > { %v1538_v52 = vadd.f32 %v2002_v50, %v1531_v51  ;;  %v2018_v50 = vld [vmem:[%s2693_s28] ss:$0 sm:$0xff] (!%p2016_p8) }
 0x8cd   : > { %v1539_v53 = vpack.c.bf16 %v1538_v52, %v1538_v52 }
 0x8cf   : > { %2128 = vmatmul.mubr.msk.bf16.vlgmr.msra.gmra.mrb[24].mxu1 %vm705_vm1, %v1539_v53 }
 0x9a2   : > { %v1600_v63 = vpop.f32.mrb[24].mxu1 }
 0x9a3   : > { %v1601_v0 = vadd.f32 %v2003_v62, %v1600_v63  ;;  %v2129_v2 = vpop.f32.mrb[25].mxu1 }
 0x9a4   : > { %v1603_v41 = vpop.f32.mrb[26].mxu1 }
 0x9a5   : > { %v1607_v3 = vmul.f32 0.70710677, %v1601_v0  ;;  %v2130_v4 = vpop.f32.mrb[27].mxu1  ;;  %v1606_v24 = vmul.f32 0.5, %v1601_v0 }
 0x9a7   : > { %v1610_v5 = vand.u32 2147483647, %v1607_v3  ;;  %vm1608_vm6 = vcmp.ge.f32.partialorder %v1607_v3, 0.0 }
 0x9a8   : > { %v1609_v22 = vsel %vm1608_vm6, 1.0, %v2276_v21 }
 0x9a9   : > { %v1611_v6 = vmul.f32 0.3275911, %v1610_v5  ;;  %v1624_v42 = vsub.f32 0.0, %v1610_v5 }
 0x9ab   : > { %v1612_v43 = vadd.f32 1.0, %v1611_v6  ;;  %v1625_v9 = vmul.f32 %v1624_v42, %v1610_v5 }
 0x9ad   : > { %2228 = vrcp.f32 %v1612_v43  ;;  %v1626_v11 = vmul.f32 1.442695, %v1625_v9 }
 0x9af   : > { %2230 = vpow2.f32 %v1626_v11 }
 0x9b7   : > { %v2229_v7 = vpop.eup %2228 }
 0x9b8   : > { %v1615_v8 = vmul.f32 1.0614054, %v2229_v7 }
 0x9b9   : > { %v2231_v18 = vpop.eup %2230 }
 0x9ba   : > { %v1616_v10 = vadd.f32 -1.4531521, %v1615_v8 }
 0x9bc   : > { %v1617_v12 = vmul.f32 %v2229_v7, %v1616_v10 }
 0x9be   : > { %v1618_v13 = vadd.f32 1.4214138, %v1617_v12 }
 0x9c0   : > { %v1619_v44 = vmul.f32 %v2229_v7, %v1618_v13 }
 0x9c2   : > { %v1620_v14 = vadd.f32 -0.28449672, %v1619_v44 }
 0x9c4   : > { %v1621_v15 = vmul.f32 %v2229_v7, %v1620_v14 }
 0x9c6   : > { %v1622_v16 = vadd.f32 0.2548296, %v1621_v15 }
 0x9c8   : > { %v1623_v17 = vmul.f32 %v2229_v7, %v1622_v16 }
 0x9ca   : > { %v1628_v19 = vmul.f32 %v2231_v18, %v1623_v17 }
 0x9cc   : > { %v1629_v20 = vsub.f32 1.0, %v1628_v19 }
 0x9ce   : > { %v1630_v23 = vmul.f32 %v1629_v20, %v1609_v22 }
 0x9d0   : > { %v1631_v25 = vadd.f32 1.0, %v1630_v23 }
 0x9d2   : > { %v1632_v26 = vmul.f32 %v1631_v25, %v1606_v24 }
 0x9d4   : > { %v1633_v27 = vpack.c.bf16 %v1632_v26, %v1632_v26 }
 0x9d6   : > { %2148 = vmatmul.mubr.bf16.vlgmr.msra.gmra.mrb[16].mxu0 %v1633_v27 }
 0xaa8   : > { %1750 = sbr.rel (%p2016_p8) target bundleno = 3050 (0xbea), region = 88 }
 0xaa9   : > { %v1739_v29 = vpop.f32.mrb[16].mxu0 }
 0xaaa   : > { %v1740_v30 = vadd.f32 %v2007_v28, %v1739_v29  ;;  %v2149_v32 = vpop.f32.mrb[17].mxu0 }
 0xaab   : > { %v1742_v33 = vpop.f32.mrb[18].mxu0 }
 0xaac   : > { %v1745_v34 = vadd.f32 %v1740_v30, %v2571_v31  ;;  %v2150_v35 = vpop.f32.mrb[19].mxu0 }
 0xaae   : > { %1746 = vst.msk [vmem:[#allocation2] sm:$0xff] %vm705_vm1, %v1745_v34  ;;  %v1753_v36 = vsel (!%p2016_p8), %vm705_vm1, %v1745_v34, 0.0 }
 0xaaf   : > { %1754 = vadd.xlane.f32.xlu0 %v1753_v36 }
 0xb3c   : > { %v1755_v37 = vpop.xlane.xlu0 %1754 }
 0xb3d   : > { %v1756_v38 = vmul.f32 0.03125, %v1755_v37 }
 0xb3f   : > { %v1757_v39 = vsub.f32 %v1745_v34, %v1756_v38 }
 0xb41   : > { %v1758_v1 = vmul.f32 %v1757_v39, %v1757_v39 }
 0xb43   : > { %v1759_v40 = vsel %vm705_vm1, %v1758_v1, 0.0 }
 0xb44   : > { %1760 = vadd.xlane.f32.xlu0 %v1759_v40 }
 0xbd1   : > { %v1761_v45 = vpop.xlane.xlu0 %1760 }
 0xbd2   : > { %v1762_v46 = vmul.f32 0.03125, %v1761_v45 }
 0xbd4   : > { %v1763_v31 = vadd.f32 1e-05, %v1762_v46 }
 0xbd6   : > { %2232 = vrsqrt.f32 %v1763_v31 }
 0xbe0   : > { %v2233_v47 = vpop.eup %2232 }
 0xbe1   : > { %v1765_v49 = vmul.f32 %v2233_v47, %v1757_v39 }
 0xbe3   : > { %v1772_v51 = vmul.f32 %v2017_v48, %v1765_v49 }
 0xbe5   : > { %v1779_v52 = vadd.f32 %v2018_v50, %v1772_v51 }
 0xbe7   : > { %v1780_v53 = vpack.c.bf16 %v1779_v52, %v1779_v52 }
 0xbe9   : > { %1782 = vst.msk [vmem:[%s2453_s3] sm:$0xf] %vm1781_vm7, %v1780_v53 }
 0xbea PF: > { %s2694_s26 = sld [smem:[#allocation6_spill]]  ;;  %s2695_s18 = sld [smem:[#allocation4_spill]] }
 0xbeb   : > { %s2696_s19 = sld [smem:[#allocation5_spill]]  ;;  %s2697_s20 = sld [smem:[#allocation7_spill]] }
 0xbec   : > { %s2698_s21 = sld [smem:[#allocation8_spill]] }
 0xbf0   : > { %s25_s22 = sadd.s32 1, %s2694_s26  }
 0xbf1   : > { %p22_p9 = scmp.ge.s32.totalorder %s25_s22, 6  }
 0xbf3   :  { %24 = sbr.rel (!%p22_p9) target bundleno = 9 (0x9), region = 154 }

</bundles_post_ra>
